<compile_context>
chip_gen: v7x
topology: tpu7x:2x2x1
jax: 0.10.0
libtpu: 0.0.40
codegen_flags: <defaults>
</compile_context>

<pallas_src>
import jax
import jax.numpy as jnp
from jax import lax
from jax.experimental import pallas as pl
from jax.experimental.pallas import tpu as pltpu


def _head_kernel(x_ref, wd_ref, bd_ref, o_ref):
    # x_ref : (TB, CHW)  flat NCHW features (bf16 or f32), lane-dense
    # wd_ref: (1, CHW)   f32, ((w[:,1]-w[:,0]) / HW) repeated HW times (flat-NCHW order)
    # bd_ref: (1,)       f32 scalar in SMEM, b[1] - b[0]
    # o_ref : (TB, 128)  lane-dense output; class-0 prob in lane 0, class-1 in lane 1
    x = x_ref[...].astype(jnp.float32)                                    # (TB, CHW)
    # logit difference: d = l1 - l0 = sum_i x_i * wd_i + bd
    d = jnp.sum(x * wd_ref[...], axis=-1, keepdims=True) + bd_ref[0]      # (TB, 1)
    # exact, numerically stable 2-class softmax from the logit difference
    z = jnp.exp(-jnp.abs(d))
    p_big = 1.0 / (1.0 + z)          # prob of the larger-logit class
    p_small = z * p_big              # prob of the smaller-logit class (no cancellation)
    p1 = jnp.where(d >= 0, p_big, p_small)
    p0 = jnp.where(d >= 0, p_small, p_big)
    lane = lax.broadcasted_iota(jnp.int32, o_ref.shape, 1)
    o_ref[...] = jnp.where(lane == 0, p0,
                           jnp.where(lane == 1, p1, 0.0)).astype(o_ref.dtype)


def _device_caps():
    """(batch-tile cap, vmem_limit_bytes) tuned per TPU generation."""
    try:
        kind = jax.devices()[0].device_kind.lower()
    except Exception:
        kind = ""
    if "v6" in kind:
        # v6e: 128 MiB physical VMEM, single TensorCore -> biggest tiles.
        return 128, 64 << 20
    if "v5e" in kind or "v5 lite" in kind or "v5litepod" in kind:
        # v5e: 16 MiB scoped default -> pin the limit explicitly, keep tiles modest.
        return 32, 24 << 20
    # v7x (64 MiB physical VMEM, 2 TensorCores) and default.
    return 64, 40 << 20


def densenet_head(features_nchw, w, b):
    """features_nchw: (B, C, H, W) (bf16 or f32); w: (C, 2); b: (2,).
    Returns (B, 2) softmax probabilities (f32)."""
    B, C, H, W = features_nchw.shape
    HW = H * W
    CHW = C * HW

    # Flat contiguous view of the NCHW features — no transpose, no HBM copy.
    x = features_nchw.reshape(B, CHW)

    # Fold AvgPool(1/HW) + Linear(C,2) + 2-class Softmax into a single
    # weight/bias difference, expanded once to flat-NCHW order.
    wdiff = (w[:, 1] - w[:, 0]).astype(jnp.float32) / HW                  # (C,)
    wd = jnp.repeat(wdiff, HW).reshape(1, CHW)                            # (1, CHW)
    bd = (b[1] - b[0]).astype(jnp.float32).reshape(1)                     # (1,)

    cap, vmem_limit = _device_caps()

    # Pad batch to a multiple of 8 (f32 sublane); padded rows are garbage and
    # sliced away below.  Cheap (<= 7 rows).
    B_pad = ((B + 7) // 8) * 8
    if B_pad != B:
        x = jnp.pad(x, ((0, B_pad - B), (0, 0)))

    TB = min(cap, B_pad)
    # Keep >= 2 grid steps when possible so 'parallel' can shard across the two
    # v7x TensorCores (and the pipeline has something to overlap).
    while TB > 8 and pl.cdiv(B_pad, TB) < 2:
        half = TB // 2
        TB = max(8, half - (half % 8))
    grid = (pl.cdiv(B_pad, TB),)

    out_padded = pl.pallas_call(
        _head_kernel,
        out_shape=jax.ShapeDtypeStruct((B_pad, 128), jnp.float32),
        grid=grid,
        in_specs=[
            pl.BlockSpec((TB, CHW), lambda i: (i, 0)),
            pl.BlockSpec((1, CHW), lambda i: (0, 0)),
            pl.BlockSpec(memory_space=pltpu.MemorySpace.SMEM),
        ],
        out_specs=pl.BlockSpec((TB, 128), lambda i: (i, 0)),
        compiler_params=pltpu.CompilerParams(
            dimension_semantics=("parallel",),
            vmem_limit_bytes=vmem_limit),
    )(x, wd, bd)
    # NOTE: PyTorch's .squeeze() also drops the batch dim when B == 1 (returns
    # shape (2,)); here we always return (B, 2).
    return out_padded[:B, :2]


def reference_head(features_nchw, w, b):
    pooled = jnp.mean(features_nchw, axis=(2, 3))            # (B, C)
    logits = pooled @ w + b
    return jax.nn.softmax(logits, axis=1)


if __name__ == "__main__":
    key = jax.random.PRNGKey(0)
    k_feat, k_w, k_b = jax.random.split(key, 3)

    B, C, H, W = 2, 1024, 7, 7
    # Stand-in for densenet121 feature-extractor output (layer['0'](image)),
    # supplied in bf16 (the kernel reduces in f32).
    features = jax.random.normal(
        k_feat, (B, C, H, W), dtype=jnp.float32).astype(jnp.bfloat16)

    # Deterministic Linear(1024, 2) params (PyTorch-style uniform(-1/sqrt(C), 1/sqrt(C))).
    bound = 1.0 / (C ** 0.5)
    w = jax.random.uniform(k_w, (C, 2), minval=-bound, maxval=bound, dtype=jnp.float32)
    b = jax.random.uniform(k_b, (2,), minval=-bound, maxval=bound, dtype=jnp.float32)

    out = densenet_head(features, w, b)
    out = jax.block_until_ready(out)

    ref = reference_head(features.astype(jnp.float32), w, b)
    assert out.shape == (B, 2)
    assert jnp.allclose(out, ref, atol=1e-5, rtol=1e-4), (out, ref)
    assert jnp.allclose(jnp.sum(out, axis=1), 1.0, atol=1e-5)

    print("KERNEL_OK")
</pallas_src>

<mosaic_0001>
module attributes {stable_mosaic.version = 11 : i64} {
  func.func @_head_kernel(%arg0: i32, %arg1: memref<8x50176xbf16, #tpu.memory_space<vmem>>, %arg2: memref<1x50176xf32, #tpu.memory_space<vmem>>, %arg3: memref<1xf32, #tpu.memory_space<smem>>, %arg4: memref<8x128xf32, #tpu.memory_space<vmem>>) attributes {dimension_semantics = [#tpu.dimension_semantics<parallel>], iteration_bounds = array<i64: 1>, scalar_prefetch = 0 : i64, scratch_operands = 0 : i64, tpu.core_type = #tpu.core_type<tc>, window_params = [{transform_indices = @transform_0, window_bounds = array<i64: 8, 50176>}, {pipeline_mode = #tpu.pipeline_mode<synchronous>, transform_indices = @transform_1, window_bounds = array<i64: 1, 50176>}, {transform_indices = @transform_2, window_bounds = array<i64: 1>}, {transform_indices = @transform_3, window_bounds = array<i64: 8, 128>}]} {
    %c0 = arith.constant 0 : index
    %c0_0 = arith.constant 0 : index
    %0 = vector.load %arg1[%c0, %c0_0] : memref<8x50176xbf16, #tpu.memory_space<vmem>>, vector<8x50176xbf16>
    %1 = arith.extf %0 : vector<8x50176xbf16> to vector<8x50176xf32>
    %c0_1 = arith.constant 0 : index
    %c0_2 = arith.constant 0 : index
    %2 = vector.load %arg2[%c0_1, %c0_2] : memref<1x50176xf32, #tpu.memory_space<vmem>>, vector<1x50176xf32>
    %3 = vector.broadcast %2 : vector<1x50176xf32> to vector<8x50176xf32>
    %4 = arith.mulf %1, %3 : vector<8x50176xf32>
    %cst = arith.constant dense<0.000000e+00> : vector<8xf32>
    %5 = vector.multi_reduction <add>, %4, %cst [1] : vector<8x50176xf32> to vector<8xf32>
    %6 = vector.shape_cast %5 : vector<8xf32> to vector<8x1xf32>
    %c0_3 = arith.constant 0 : index
    %7 = memref.load %arg3[%c0_3] : memref<1xf32, #tpu.memory_space<smem>>
    %8 = vector.broadcast %7 : f32 to vector<8x1xf32>
    %9 = arith.addf %6, %8 : vector<8x1xf32>
    %10 = math.absf %9 : vector<8x1xf32>
    %cst_4 = arith.constant 0.000000e+00 : f32
    %11 = vector.broadcast %cst_4 : f32 to vector<8x1xf32>
    %12 = arith.subf %11, %10 : vector<8x1xf32>
    %13 = math.exp %12 : vector<8x1xf32>
    %cst_5 = arith.constant 1.000000e+00 : f32
    %14 = vector.broadcast %cst_5 : f32 to vector<8x1xf32>
    %15 = arith.addf %14, %13 : vector<8x1xf32>
    %cst_6 = arith.constant 1.000000e+00 : f32
    %16 = vector.broadcast %cst_6 : f32 to vector<8x1xf32>
    %17 = arith.divf %16, %15 : vector<8x1xf32>
    %18 = arith.mulf %13, %17 : vector<8x1xf32>
    %cst_7 = arith.constant 0.000000e+00 : f32
    %19 = vector.broadcast %cst_7 : f32 to vector<8x1xf32>
    %20 = arith.cmpf oge, %9, %19 : vector<8x1xf32>
    %21 = arith.select %20, %17, %18 : vector<8x1xi1>, vector<8x1xf32>
    %cst_8 = arith.constant 0.000000e+00 : f32
    %22 = vector.broadcast %cst_8 : f32 to vector<8x1xf32>
    %23 = arith.cmpf oge, %9, %22 : vector<8x1xf32>
    %24 = arith.select %23, %18, %17 : vector<8x1xi1>, vector<8x1xf32>
    %25 = tpu.iota {dimensions = array<i32: 1>} : vector<8x128xi32>
    %c0_i32 = arith.constant 0 : i32
    %26 = vector.broadcast %c0_i32 : i32 to vector<8x128xi32>
    %27 = arith.cmpi eq, %25, %26 : vector<8x128xi32>
    %c1_i32 = arith.constant 1 : i32
    %28 = vector.broadcast %c1_i32 : i32 to vector<8x128xi32>
    %29 = arith.cmpi eq, %25, %28 : vector<8x128xi32>
    %cst_9 = arith.constant 0.000000e+00 : f32
    %30 = vector.shape_cast %21 : vector<8x1xf32> to vector<8x1xf32>
    %31 = vector.broadcast %30 : vector<8x1xf32> to vector<8x128xf32>
    %32 = vector.broadcast %cst_9 : f32 to vector<8x128xf32>
    %33 = arith.select %29, %31, %32 : vector<8x128xi1>, vector<8x128xf32>
    %34 = vector.shape_cast %24 : vector<8x1xf32> to vector<8x1xf32>
    %35 = vector.broadcast %34 : vector<8x1xf32> to vector<8x128xf32>
    %36 = arith.select %27, %35, %33 : vector<8x128xi1>, vector<8x128xf32>
    %c0_10 = arith.constant 0 : index
    %c0_11 = arith.constant 0 : index
    %37 = vector.load %arg4[%c0_10, %c0_11] : memref<8x128xf32, #tpu.memory_space<vmem>>, vector<8x128xf32>
    tpu.vector_store %arg4[%c0_10, %c0_11], %36 {strides = array<i32>} : memref<8x128xf32, #tpu.memory_space<vmem>>, vector<8x128xf32>,
    return
  }
  func.func @transform_0(%arg0: i32) -> (i32, i32) {
    %c0_i32 = arith.constant 0 : i32
    %c0_i32_0 = arith.constant 0 : i32
    return %arg0, %c0_i32 : i32, i32
  }
  func.func @transform_1(%arg0: i32) -> (i32, i32) {
    %c0_i32 = arith.constant 0 : i32
    %c0_i32_0 = arith.constant 0 : i32
    %c0_i32_1 = arith.constant 0 : i32
    return %c0_i32, %c0_i32_0 : i32, i32
  }
  func.func @transform_2(%arg0: i32) -> i32 {
    %c0_i32 = arith.constant 0 : i32
    %c0_i32_0 = arith.constant 0 : i32
    return %c0_i32 : i32
  }
  func.func @transform_3(%arg0: i32) -> (i32, i32) {
    %c0_i32 = arith.constant 0 : i32
    %c0_i32_0 = arith.constant 0 : i32
    return %arg0, %c0_i32 : i32, i32
  }
}

</mosaic_0001>

<bundles_post_ra>
// kernel: tpu_custom_call.1
= control target key start
LH: loop header
LB: loop body
LE: loop exit
PB: predicated region body
PF: predicated region fallthrough
CT: control target
= control target key end

     0   :  { %9 = vsyncpa [#allocation4], 0  ;;  %s4059_s0 = inlined_call_operand.hbm [shape: bf16[8,50176], index: 0, kind: input, shape index: {}]   ;;  %s4060_s1 = inlined_call_operand.hbm [shape: f32[1,50176], index: 1, kind: input, shape index: {}]   ;;  %s4061_s2 = inlined_call_operand.<no memory space> [shape: f32[1], index: 2, kind: input, shape index: {}]   ;;  %s4062_s3 = inlined_call_operand.hbm [shape: f32[8,128], index: 3, kind: output, shape index: {}]  }
   0x1   :  { %10 = vsyncpa [#allocation7], 0 }
   0x2   :  { %11 = vsyncpa [#allocation5], 0  ;;  %s3587_s12 = smov [#allocation3]   ;;  %s3588_s14 = smov [#allocation6]  }
   0x3   :  { %s18_s13 = sshll.u32 %s3587_s12, 4  ;;  %s28_s15 = sshll.u32 %s3588_s14, 4  ;;  %s19_s13 = int_to_ptr.vmem [resolvable:$true] %s18_s13  ;;  %s29_s15 = int_to_ptr.vmem [resolvable:$true] %s28_s15 }
   0x4   :  { %s3515_s18 = scalar_lea.hbm %s4059_s0, 25088 }
   0x5   :  { %p3516_p0 = scmp.ne.s32.totalorder %s4059_s0, %s3515_s18  ;;  %p3519_p1 = scmp.lt.u32.totalorder %s3515_s18, %s4059_s0 }
   0x7   :  { %p3521_p2 = pnand %p3519_p1, %p3516_p0 }
   0x9   :  { %3524 = shalt.err (!%p3521_p2)
}
   0xa   :  { %s3525_s23 = scalar_lea.vmem %s19_s13, 25088  ;;  %p3530_p4 = scmp.lt.s32.totalorder %s19_s13, %s19_s13 }
   0xb   :  { %p3526_p3 = scmp.ne.s32.totalorder %s19_s13, %s3525_s23  ;;  %p3531_p5 = scmp.lt.s32.totalorder %s3525_s23, %s3525_s23 }
   0xd   :  { %p3532_p6 = por %p3531_p5, %p3530_p4 }
   0xf   :  { %p3533_p7 = pnand %p3532_p6, %p3526_p3 }
  0x11   :  { %3536 = shalt.err (!%p3533_p7)
}
  0x12   :  { %21 = dma.hbm_to_vmem [thread:$0]  %s4059_s0, 25088, %s19_s13, [#allocation4]  }
  0x13   :  { %s3537_s28 = scalar_lea.hbm %s4060_s1, 6272 }
  0x14   :  { %p3538_p8 = scmp.ne.s32.totalorder %s4060_s1, %s3537_s28  ;;  %p3541_p9 = scmp.lt.u32.totalorder %s3537_s28, %s4060_s1 }
  0x16   :  { %p3543_p10 = pnand %p3541_p9, %p3538_p8 }
  0x18   :  { %3546 = shalt.err (!%p3543_p10)
}
  0x19   :  { %s3547_s6 = scalar_lea.vmem %s29_s15, 6272  ;;  %p3552_p12 = scmp.lt.s32.totalorder %s29_s15, %s29_s15 }
  0x1a   :  { %p3548_p11 = scmp.ne.s32.totalorder %s29_s15, %s3547_s6  ;;  %p3553_p13 = scmp.lt.s32.totalorder %s3547_s6, %s3547_s6 }
  0x1c   :  { %p3554_p0 = por %p3553_p13, %p3552_p12 }
  0x1e   :  { %p3555_p1 = pnand %p3554_p0, %p3548_p11 }
  0x20   :  { %3558 = shalt.err (!%p3555_p1)
}
  0x21   :  { %31 = dma.hbm_to_vmem [thread:$0]  %s4060_s1, 6272, %s29_s15, [#allocation7]  }
  0x22   :  { %3581 = dma.done.wait [#allocation4], 25088  }
  0x23   :  { %3582 = vsyncadd [#allocation4], 4294942208 }
  0x24   :  { %3583 = dma.done.wait [#allocation7], 6272  }
  0x25   :  { %3584 = vsyncadd [#allocation7], 4294961024  ;;  %v726_v0 = vlaneseq  ;;  %v40_v4 = vld [vmem:[#allocation3] sm:$0xff]  ;;  %v41_v7 = vld [vmem:[#allocation3 + $0x8] sm:$0xff]  ;;  %s3589_s9 = smov [#allocation8]  }
  0x26   :  { %v628_v5 = vld [vmem:[#allocation6] sm:$0xff]  ;;  %v236_v9 = vunpack.c.l.bf16 %v40_v4  ;;  %v237_v10 = vunpack.c.h.bf16 %v40_v4  ;;  %v238_v13 = vunpack.c.l.bf16 %v41_v7  ;;  %v42_v16 = vld [vmem:[#allocation3 + $0x10] sm:$0xff]  ;;  %v239_v18 = vunpack.c.h.bf16 %v41_v7  ;;  %v43_v26 = vld [vmem:[#allocation3 + $0x18] sm:$0xff]  ;;  %s3498_s10 = sshll.u32 %s3589_s9, 4  ;;  %s3499_s10 = int_to_ptr.vmem [resolvable:$true] %s3498_s10 }
  0x27   :  { %v727_v1 = vshrl.u32 %v726_v0, 7  ;;  %v240_v22 = vunpack.c.l.bf16 %v42_v16  ;;  %v241_v28 = vunpack.c.h.bf16 %v42_v16  ;;  %v242_v32 = vunpack.c.l.bf16 %v43_v26  ;;  %v44_v36 = vld [vmem:[#allocation3 + $0x20] sm:$0xff]  ;;  %v629_v37 = vld [vmem:[#allocation6 + $0x8] sm:$0xff]  ;;  %v46_v55 = vld [vmem:[#allocation3 + $0x30] sm:$0xff]  ;;  %p3564_p3 = scmp.lt.s32.totalorder %s3499_s10, %s3499_s10 }
  0x28   :  { %v243_v38 = vunpack.c.h.bf16 %v43_v26  ;;  %v244_v42 = vunpack.c.l.bf16 %v44_v36  ;;  %v45_v46 = vld [vmem:[#allocation3 + $0x28] sm:$0xff]  ;;  %v245_v47 = vunpack.c.h.bf16 %v44_v36  ;;  %v248_v60 = vunpack.c.l.bf16 %v46_v55  ;;  %v630_v16 = vld [vmem:[#allocation6 + $0x10] sm:$0xff] }
  0x29   :  { %v3635_v2 = vsub.s32 0, %v727_v1  ;;  %v3637_v3 = vsub.s32 1, %v727_v1  ;;  %v3639_v6 = vsub.s32 2, %v727_v1  ;;  %v3641_v8 = vsub.s32 3, %v727_v1 }
  0x2a   :  { %v3646_v15 = vsub.s32 4, %v727_v1  ;;  %v3648_v17 = vsub.s32 5, %v727_v1  ;;  %v3652_v24 = vsub.s32 6, %v727_v1  ;;  %v3654_v27 = vsub.s32 7, %v727_v1  ;;  %v47_v1 = vld [vmem:[#allocation3 + $0x38] sm:$0xff] }
  0x2b   :  { %v729_v11 = vrot.slane %v628_v5, %v3635_v2  ;;  %v733_v12 = vrot.slane %v628_v5, %v3637_v3  ;;  %v737_v14 = vrot.slane %v628_v5, %v3639_v6  ;;  %v741_v19 = vrot.slane %v628_v5, %v3641_v8 }
  0x2c   :  { %v745_v23 = vrot.slane %v628_v5, %v3646_v15  ;;  %v749_v29 = vrot.slane %v628_v5, %v3648_v17  ;;  %v753_v33 = vrot.slane %v628_v5, %v3652_v24  ;;  %v757_v39 = vrot.slane %v628_v5, %v3654_v27 }
  0x2d   :  { %v2686_v20 = vmul.f32 %v729_v11, %v236_v9  ;;  %v2687_v21 = vmul.f32 %v733_v12, %v237_v10  ;;  %v2688_v25 = vmul.f32 %v737_v14, %v238_v13  ;;  %v2689_v30 = vmul.f32 %v741_v19, %v239_v18  ;;  %v48_v14 = vld [vmem:[#allocation3 + $0x40] sm:$0xff] }
  0x2e   :  { %v2690_v34 = vmul.f32 %v745_v23, %v240_v22  ;;  %v2691_v40 = vmul.f32 %v749_v29, %v241_v28  ;;  %v761_v43 = vrot.slane %v629_v37, %v3635_v2  ;;  %v2692_v44 = vmul.f32 %v753_v33, %v242_v32  ;;  %v49_v28 = vld [vmem:[#allocation3 + $0x48] sm:$0xff] }
  0x2f   :  { %v3078_v31 = vadd.f32 %v2687_v21, %v2686_v20  ;;  %v765_v48 = vrot.slane %v629_v37, %v3637_v3  ;;  %v2693_v49 = vmul.f32 %v757_v39, %v243_v38  ;;  %v246_v51 = vunpack.c.l.bf16 %v45_v46  ;;  %v50_v38 = vld [vmem:[#allocation3 + $0x50] sm:$0xff] }
  0x30   :  { %v769_v52 = vrot.slane %v629_v37, %v3639_v6  ;;  %v2694_v53 = vmul.f32 %v761_v43, %v244_v42  ;;  %v247_v56 = vunpack.c.h.bf16 %v45_v46  ;;  %v773_v57 = vrot.slane %v629_v37, %v3641_v8  ;;  %v51_v46 = vld [vmem:[#allocation3 + $0x58] sm:$0xff] }
  0x31   :  { %v3079_v35 = vadd.f32 %v3078_v31, %v2688_v25  ;;  %v2695_v58 = vmul.f32 %v765_v48, %v245_v47  ;;  %v777_v61 = vrot.slane %v629_v37, %v3646_v15  ;;  %v249_v4 = vunpack.c.h.bf16 %v46_v55  ;;  %v52_v55 = vld [vmem:[#allocation3 + $0x60] sm:$0xff] }
  0x32   :  { %v2696_v62 = vmul.f32 %v769_v52, %v246_v51  ;;  %v781_v5 = vrot.slane %v629_v37, %v3648_v17  ;;  %v2697_v7 = vmul.f32 %v773_v57, %v247_v56  ;;  %v250_v10 = vunpack.c.l.bf16 %v47_v1  ;;  %v631_v56 = vld [vmem:[#allocation6 + $0x18] sm:$0xff] }
  0x33   :  { %v3080_v41 = vadd.f32 %v3079_v35, %v2689_v30  ;;  %v785_v11 = vrot.slane %v629_v37, %v3652_v24  ;;  %v2698_v12 = vmul.f32 %v777_v61, %v248_v60  ;;  %v251_v18 = vunpack.c.h.bf16 %v47_v1 }
  0x34   :  { %v789_v19 = vrot.slane %v629_v37, %v3654_v27  ;;  %v2699_v20 = vmul.f32 %v781_v5, %v249_v4  ;;  %v252_v22 = vunpack.c.l.bf16 %v48_v14  ;;  %v793_v23 = vrot.slane %v630_v16, %v3635_v2  ;;  %v53_v4 = vld [vmem:[#allocation3 + $0x68] sm:$0xff] }
  0x35   :  { %v3081_v45 = vadd.f32 %v3080_v41, %v2690_v34  ;;  %v2700_v25 = vmul.f32 %v785_v11, %v250_v10  ;;  %v253_v29 = vunpack.c.h.bf16 %v48_v14  ;;  %v797_v30 = vrot.slane %v630_v16, %v3637_v3 }
  0x36   :  { %v2701_v31 = vmul.f32 %v789_v19, %v251_v18  ;;  %v254_v33 = vunpack.c.l.bf16 %v49_v28  ;;  %v801_v34 = vrot.slane %v630_v16, %v3639_v6  ;;  %v2702_v35 = vmul.f32 %v793_v23, %v252_v22  ;;  %v54_v18 = vld [vmem:[#allocation3 + $0x70] sm:$0xff] }
  0x37   :  { %v3082_v50 = vadd.f32 %v3081_v45, %v2691_v40  ;;  %v255_v37 = vunpack.c.h.bf16 %v49_v28  ;;  %v805_v39 = vrot.slane %v630_v16, %v3641_v8  ;;  %v2703_v40 = vmul.f32 %v797_v30, %v253_v29  ;;  %v55_v28 = vld [vmem:[#allocation3 + $0x78] sm:$0xff] }
  0x38   :  { %v256_v42 = vunpack.c.l.bf16 %v50_v38  ;;  %v809_v43 = vrot.slane %v630_v16, %v3646_v15  ;;  %v257_v47 = vunpack.c.h.bf16 %v50_v38  ;;  %v813_v48 = vrot.slane %v630_v16, %v3648_v17  ;;  %v56_v38 = vld [vmem:[#allocation3 + $0x80] sm:$0xff] }
  0x39   :  { %v3083_v54 = vadd.f32 %v3082_v50, %v2692_v44  ;;  %v2704_v44 = vmul.f32 %v801_v34, %v254_v33  ;;  %v258_v51 = vunpack.c.l.bf16 %v51_v46  ;;  %v817_v52 = vrot.slane %v630_v16, %v3652_v24 }
  0x3a   :  { %v259_v57 = vunpack.c.h.bf16 %v51_v46  ;;  %v260_v61 = vunpack.c.l.bf16 %v52_v55  ;;  %v261_v5 = vunpack.c.h.bf16 %v52_v55  ;;  %v262_v11 = vunpack.c.l.bf16 %v53_v4 }
  0x3b   :  { %v3084_v59 = vadd.f32 %v3083_v54, %v2693_v49  ;;  %v2705_v49 = vmul.f32 %v805_v39, %v255_v37  ;;  %v837_v19 = vrot.slane %v631_v56, %v3641_v8  ;;  %v264_v22 = vunpack.c.l.bf16 %v54_v18  ;;  %v632_v37 = vld [vmem:[#allocation6 + $0x20] sm:$0xff] }
  0x3c   :  { %v841_v23 = vrot.slane %v631_v56, %v3646_v15  ;;  %v265_v29 = vunpack.c.h.bf16 %v54_v18  ;;  %v845_v30 = vrot.slane %v631_v56, %v3648_v17  ;;  %v266_v33 = vunpack.c.l.bf16 %v55_v28  ;;  %v60_v18 = vld [vmem:[#allocation3 + $0xa0] sm:$0xff] }
  0x3d   :  { %v3085_v63 = vadd.f32 %v3084_v59, %v2694_v53  ;;  %v2706_v53 = vmul.f32 %v809_v43, %v256_v42  ;;  %v2707_v59 = vmul.f32 %v813_v48, %v257_v47  ;;  %v849_v34 = vrot.slane %v631_v56, %v3652_v24  ;;  %v57_v47 = vld [vmem:[#allocation3 + $0x88] sm:$0xff] }
  0x3e   :  { %v267_v39 = vunpack.c.h.bf16 %v55_v28  ;;  %v268_v43 = vunpack.c.l.bf16 %v56_v38  ;;  %v269_v48 = vunpack.c.h.bf16 %v56_v38 }
  0x3f   :  { %v3086_v9 = vadd.f32 %v3085_v63, %v2695_v58  ;;  %v821_v58 = vrot.slane %v630_v16, %v3654_v27  ;;  %v2708_v63 = vmul.f32 %v817_v52, %v258_v51  ;;  %v263_v16 = vunpack.c.h.bf16 %v53_v4  ;;  %v59_v4 = vld [vmem:[#allocation3 + $0x98] sm:$0xff] }
  0x40   :  { %v270_v52 = vunpack.c.l.bf16 %v57_v47 }
  0x41   :  { %v3087_v13 = vadd.f32 %v3086_v9, %v2696_v62  ;;  %v825_v62 = vrot.slane %v631_v56, %v3635_v2  ;;  %v2709_v9 = vmul.f32 %v821_v58, %v259_v57  ;;  %v58_v57 = vld [vmem:[#allocation3 + $0x90] sm:$0xff]  ;;  %v869_v58 = vrot.slane %v632_v37, %v3641_v8 }
  0x43   :  { %v3088_v21 = vadd.f32 %v3087_v13, %v2697_v7  ;;  %v829_v7 = vrot.slane %v631_v56, %v3637_v3  ;;  %v2710_v13 = vmul.f32 %v825_v62, %v260_v61  ;;  %v272_v61 = vunpack.c.l.bf16 %v58_v57 }
  0x44   :  { %v873_v62 = vrot.slane %v632_v37, %v3646_v15 }
  0x45   :  { %v3089_v26 = vadd.f32 %v3088_v21, %v2698_v12  ;;  %v833_v12 = vrot.slane %v631_v56, %v3639_v6 }
  0x47   :  { %v3090_v32 = vadd.f32 %v3089_v26, %v2699_v20  ;;  %v2711_v20 = vmul.f32 %v829_v7, %v261_v5  ;;  %v273_v5 = vunpack.c.h.bf16 %v58_v57  ;;  %v877_v7 = vrot.slane %v632_v37, %v3648_v17  ;;  %v64_v57 = vld [vmem:[#allocation3 + $0xc0] sm:$0xff] }
  0x49   :  { %v3091_v36 = vadd.f32 %v3090_v32, %v2700_v25  ;;  %v2712_v25 = vmul.f32 %v833_v12, %v262_v11  ;;  %v274_v11 = vunpack.c.l.bf16 %v59_v4  ;;  %v881_v12 = vrot.slane %v632_v37, %v3652_v24 }
  0x4b   :  { %v3092_v41 = vadd.f32 %v3091_v36, %v2701_v31  ;;  %v2713_v31 = vmul.f32 %v837_v19, %v263_v16  ;;  %v633_v16 = vld [vmem:[#allocation6 + $0x28] sm:$0xff]  ;;  %v275_v19 = vunpack.c.h.bf16 %v59_v4 }
  0x4d   :  { %v3093_v45 = vadd.f32 %v3092_v41, %v2702_v35  ;;  %v2714_v35 = vmul.f32 %v841_v23, %v264_v22  ;;  %v2715_v41 = vmul.f32 %v845_v30, %v265_v29  ;;  %v276_v23 = vunpack.c.l.bf16 %v60_v18  ;;  %v61_v29 = vld [vmem:[#allocation3 + $0xa8] sm:$0xff] }
  0x4e   :  { %v277_v30 = vunpack.c.h.bf16 %v60_v18 }
  0x4f   :  { %v3094_v50 = vadd.f32 %v3093_v45, %v2703_v40  ;;  %v853_v40 = vrot.slane %v631_v56, %v3654_v27  ;;  %v2716_v45 = vmul.f32 %v849_v34, %v266_v33  ;;  %v271_v56 = vunpack.c.h.bf16 %v57_v47  ;;  %v63_v47 = vld [vmem:[#allocation3 + $0xb8] sm:$0xff] }
  0x50   :  { %v278_v34 = vunpack.c.l.bf16 %v61_v29 }
  0x51   :  { %v3095_v54 = vadd.f32 %v3094_v50, %v2704_v44  ;;  %v857_v44 = vrot.slane %v632_v37, %v3635_v2  ;;  %v2717_v50 = vmul.f32 %v853_v40, %v267_v39  ;;  %v62_v39 = vld [vmem:[#allocation3 + $0xb0] sm:$0xff]  ;;  %v901_v40 = vrot.slane %v633_v16, %v3641_v8 }
  0x53   :  { %v3096_v60 = vadd.f32 %v3095_v54, %v2705_v49  ;;  %v861_v49 = vrot.slane %v632_v37, %v3637_v3  ;;  %v2718_v54 = vmul.f32 %v857_v44, %v268_v43  ;;  %v280_v43 = vunpack.c.l.bf16 %v62_v39 }
  0x54   :  { %v905_v44 = vrot.slane %v633_v16, %v3646_v15 }
  0x55   :  { %v3097_v1 = vadd.f32 %v3096_v60, %v2706_v53  ;;  %v865_v53 = vrot.slane %v632_v37, %v3639_v6 }
  0x57   :  { %v3098_v10 = vadd.f32 %v3097_v1, %v2707_v59  ;;  %v2719_v59 = vmul.f32 %v861_v49, %v269_v48  ;;  %v281_v48 = vunpack.c.h.bf16 %v62_v39  ;;  %v909_v49 = vrot.slane %v633_v16, %v3648_v17  ;;  %v68_v39 = vld [vmem:[#allocation3 + $0xe0] sm:$0xff] }
  0x59   :  { %v3099_v14 = vadd.f32 %v3098_v10, %v2708_v63  ;;  %v2720_v63 = vmul.f32 %v865_v53, %v270_v52  ;;  %v282_v52 = vunpack.c.l.bf16 %v63_v47  ;;  %v913_v53 = vrot.slane %v633_v16, %v3652_v24 }
  0x5b   :  { %v3100_v21 = vadd.f32 %v3099_v14, %v2709_v9  ;;  %v2721_v9 = vmul.f32 %v869_v58, %v271_v56  ;;  %v634_v56 = vld [vmem:[#allocation6 + $0x30] sm:$0xff]  ;;  %v283_v58 = vunpack.c.h.bf16 %v63_v47 }
  0x5d   :  { %v3101_v26 = vadd.f32 %v3100_v21, %v2710_v13  ;;  %v2722_v13 = vmul.f32 %v873_v62, %v272_v61  ;;  %v2723_v21 = vmul.f32 %v877_v7, %v273_v5  ;;  %v284_v62 = vunpack.c.l.bf16 %v64_v57  ;;  %v65_v5 = vld [vmem:[#allocation3 + $0xc8] sm:$0xff] }
  0x5e   :  { %v285_v7 = vunpack.c.h.bf16 %v64_v57 }
  0x5f   :  { %v3102_v32 = vadd.f32 %v3101_v26, %v2711_v20  ;;  %v885_v20 = vrot.slane %v632_v37, %v3654_v27  ;;  %v2724_v26 = vmul.f32 %v881_v12, %v274_v11  ;;  %v279_v37 = vunpack.c.h.bf16 %v61_v29  ;;  %v67_v29 = vld [vmem:[#allocation3 + $0xd8] sm:$0xff] }
  0x60   :  { %v286_v12 = vunpack.c.l.bf16 %v65_v5 }
  0x61   :  { %v3103_v36 = vadd.f32 %v3102_v32, %v2712_v25  ;;  %v889_v25 = vrot.slane %v633_v16, %v3635_v2  ;;  %v2725_v32 = vmul.f32 %v885_v20, %v275_v19  ;;  %v66_v19 = vld [vmem:[#allocation3 + $0xd0] sm:$0xff]  ;;  %v933_v20 = vrot.slane %v634_v56, %v3641_v8 }
  0x63   :  { %v3104_v42 = vadd.f32 %v3103_v36, %v2713_v31  ;;  %v893_v31 = vrot.slane %v633_v16, %v3637_v3  ;;  %v2726_v36 = vmul.f32 %v889_v25, %v276_v23  ;;  %v288_v23 = vunpack.c.l.bf16 %v66_v19 }
  0x64   :  { %v937_v25 = vrot.slane %v634_v56, %v3646_v15 }
  0x65   :  { %v3105_v46 = vadd.f32 %v3104_v42, %v2714_v35  ;;  %v897_v35 = vrot.slane %v633_v16, %v3639_v6 }
  0x67   :  { %v3106_v51 = vadd.f32 %v3105_v46, %v2715_v41  ;;  %v2727_v41 = vmul.f32 %v893_v31, %v277_v30  ;;  %v289_v30 = vunpack.c.h.bf16 %v66_v19  ;;  %v941_v31 = vrot.slane %v634_v56, %v3648_v17  ;;  %v72_v19 = vld [vmem:[#allocation3 + $0x100] sm:$0xff] }
  0x69   :  { %v3107_v55 = vadd.f32 %v3106_v51, %v2716_v45  ;;  %v2728_v45 = vmul.f32 %v897_v35, %v278_v34  ;;  %v290_v34 = vunpack.c.l.bf16 %v67_v29  ;;  %v945_v35 = vrot.slane %v634_v56, %v3652_v24 }
  0x6b   :  { %v3108_v60 = vadd.f32 %v3107_v55, %v2717_v50  ;;  %v2729_v50 = vmul.f32 %v901_v40, %v279_v37  ;;  %v635_v37 = vld [vmem:[#allocation6 + $0x38] sm:$0xff]  ;;  %v291_v40 = vunpack.c.h.bf16 %v67_v29 }
  0x6d   :  { %v3109_v1 = vadd.f32 %v3108_v60, %v2718_v54  ;;  %v2730_v54 = vmul.f32 %v905_v44, %v280_v43  ;;  %v2731_v60 = vmul.f32 %v909_v49, %v281_v48  ;;  %v292_v44 = vunpack.c.l.bf16 %v68_v39  ;;  %v69_v48 = vld [vmem:[#allocation3 + $0xe8] sm:$0xff] }
  0x6e   :  { %v293_v49 = vunpack.c.h.bf16 %v68_v39 }
  0x6f   :  { %v3110_v10 = vadd.f32 %v3109_v1, %v2719_v59  ;;  %v917_v59 = vrot.slane %v633_v16, %v3654_v27  ;;  %v2732_v1 = vmul.f32 %v913_v53, %v282_v52  ;;  %v287_v16 = vunpack.c.h.bf16 %v65_v5  ;;  %v71_v5 = vld [vmem:[#allocation3 + $0xf8] sm:$0xff] }
  0x70   :  { %v294_v53 = vunpack.c.l.bf16 %v69_v48 }
  0x71   :  { %v3111_v14 = vadd.f32 %v3110_v10, %v2720_v63  ;;  %v921_v63 = vrot.slane %v634_v56, %v3635_v2  ;;  %v2733_v10 = vmul.f32 %v917_v59, %v283_v58  ;;  %v70_v58 = vld [vmem:[#allocation3 + $0xf0] sm:$0xff]  ;;  %v965_v59 = vrot.slane %v635_v37, %v3641_v8 }
  0x73   :  { %v3112_v22 = vadd.f32 %v3111_v14, %v2721_v9  ;;  %v925_v9 = vrot.slane %v634_v56, %v3637_v3  ;;  %v2734_v14 = vmul.f32 %v921_v63, %v284_v62  ;;  %v296_v62 = vunpack.c.l.bf16 %v70_v58 }
  0x74   :  { %v969_v63 = vrot.slane %v635_v37, %v3646_v15 }
  0x75   :  { %v3113_v28 = vadd.f32 %v3112_v22, %v2722_v13  ;;  %v929_v13 = vrot.slane %v634_v56, %v3639_v6 }
  0x77   :  { %v3114_v33 = vadd.f32 %v3113_v28, %v2723_v21  ;;  %v2735_v21 = vmul.f32 %v925_v9, %v285_v7  ;;  %v297_v7 = vunpack.c.h.bf16 %v70_v58  ;;  %v973_v9 = vrot.slane %v635_v37, %v3648_v17  ;;  %v76_v58 = vld [vmem:[#allocation3 + $0x120] sm:$0xff] }
  0x79   :  { %v3115_v38 = vadd.f32 %v3114_v33, %v2724_v26  ;;  %v2736_v26 = vmul.f32 %v929_v13, %v286_v12  ;;  %v298_v12 = vunpack.c.l.bf16 %v71_v5  ;;  %v977_v13 = vrot.slane %v635_v37, %v3652_v24 }
  0x7b   :  { %v3116_v42 = vadd.f32 %v3115_v38, %v2725_v32  ;;  %v2737_v32 = vmul.f32 %v933_v20, %v287_v16  ;;  %v636_v16 = vld [vmem:[#allocation6 + $0x40] sm:$0xff]  ;;  %v299_v20 = vunpack.c.h.bf16 %v71_v5 }
  0x7d   :  { %v3117_v46 = vadd.f32 %v3116_v42, %v2726_v36  ;;  %v2738_v36 = vmul.f32 %v937_v25, %v288_v23  ;;  %v2739_v42 = vmul.f32 %v941_v31, %v289_v30  ;;  %v300_v25 = vunpack.c.l.bf16 %v72_v19  ;;  %v73_v30 = vld [vmem:[#allocation3 + $0x108] sm:$0xff] }
  0x7e   :  { %v301_v31 = vunpack.c.h.bf16 %v72_v19 }
  0x7f   :  { %v3118_v51 = vadd.f32 %v3117_v46, %v2727_v41  ;;  %v949_v41 = vrot.slane %v634_v56, %v3654_v27  ;;  %v2740_v46 = vmul.f32 %v945_v35, %v290_v34  ;;  %v295_v56 = vunpack.c.h.bf16 %v69_v48  ;;  %v75_v48 = vld [vmem:[#allocation3 + $0x118] sm:$0xff] }
  0x80   :  { %v302_v35 = vunpack.c.l.bf16 %v73_v30 }
  0x81   :  { %v3119_v55 = vadd.f32 %v3118_v51, %v2728_v45  ;;  %v953_v45 = vrot.slane %v635_v37, %v3635_v2  ;;  %v2741_v51 = vmul.f32 %v949_v41, %v291_v40  ;;  %v74_v40 = vld [vmem:[#allocation3 + $0x110] sm:$0xff]  ;;  %v997_v41 = vrot.slane %v636_v16, %v3641_v8 }
  0x83   :  { %v3120_v61 = vadd.f32 %v3119_v55, %v2729_v50  ;;  %v957_v50 = vrot.slane %v635_v37, %v3637_v3  ;;  %v2742_v55 = vmul.f32 %v953_v45, %v292_v44  ;;  %v304_v44 = vunpack.c.l.bf16 %v74_v40 }
  0x84   :  { %v1001_v45 = vrot.slane %v636_v16, %v3646_v15 }
  0x85   :  { %v3121_v4 = vadd.f32 %v3120_v61, %v2730_v54  ;;  %v961_v54 = vrot.slane %v635_v37, %v3639_v6 }
  0x87   :  { %v3122_v11 = vadd.f32 %v3121_v4, %v2731_v60  ;;  %v2743_v60 = vmul.f32 %v957_v50, %v293_v49  ;;  %v305_v49 = vunpack.c.h.bf16 %v74_v40  ;;  %v1005_v50 = vrot.slane %v636_v16, %v3648_v17  ;;  %v80_v40 = vld [vmem:[#allocation3 + $0x140] sm:$0xff] }
  0x89   :  { %v3123_v18 = vadd.f32 %v3122_v11, %v2732_v1  ;;  %v2744_v1 = vmul.f32 %v961_v54, %v294_v53  ;;  %v306_v53 = vunpack.c.l.bf16 %v75_v48  ;;  %v1009_v54 = vrot.slane %v636_v16, %v3652_v24 }
  0x8b   :  { %v3124_v22 = vadd.f32 %v3123_v18, %v2733_v10  ;;  %v2745_v10 = vmul.f32 %v965_v59, %v295_v56  ;;  %v637_v56 = vld [vmem:[#allocation6 + $0x48] sm:$0xff]  ;;  %v307_v59 = vunpack.c.h.bf16 %v75_v48 }
  0x8d   :  { %v3125_v28 = vadd.f32 %v3124_v22, %v2734_v14  ;;  %v2746_v14 = vmul.f32 %v969_v63, %v296_v62  ;;  %v2747_v22 = vmul.f32 %v973_v9, %v297_v7  ;;  %v308_v63 = vunpack.c.l.bf16 %v76_v58  ;;  %v77_v7 = vld [vmem:[#allocation3 + $0x128] sm:$0xff] }
  0x8e   :  { %v309_v9 = vunpack.c.h.bf16 %v76_v58 }
  0x8f   :  { %v3126_v33 = vadd.f32 %v3125_v28, %v2735_v21  ;;  %v981_v21 = vrot.slane %v635_v37, %v3654_v27  ;;  %v2748_v28 = vmul.f32 %v977_v13, %v298_v12  ;;  %v303_v37 = vunpack.c.h.bf16 %v73_v30  ;;  %v79_v30 = vld [vmem:[#allocation3 + $0x138] sm:$0xff] }
  0x90   :  { %v310_v13 = vunpack.c.l.bf16 %v77_v7 }
  0x91   :  { %v3127_v38 = vadd.f32 %v3126_v33, %v2736_v26  ;;  %v985_v26 = vrot.slane %v636_v16, %v3635_v2  ;;  %v2749_v33 = vmul.f32 %v981_v21, %v299_v20  ;;  %v78_v20 = vld [vmem:[#allocation3 + $0x130] sm:$0xff]  ;;  %v1029_v21 = vrot.slane %v637_v56, %v3641_v8 }
  0x93   :  { %v3128_v43 = vadd.f32 %v3127_v38, %v2737_v32  ;;  %v989_v32 = vrot.slane %v636_v16, %v3637_v3  ;;  %v2750_v38 = vmul.f32 %v985_v26, %v300_v25  ;;  %v312_v25 = vunpack.c.l.bf16 %v78_v20 }
  0x94   :  { %v1033_v26 = vrot.slane %v637_v56, %v3646_v15 }
  0x95   :  { %v3129_v47 = vadd.f32 %v3128_v43, %v2738_v36  ;;  %v993_v36 = vrot.slane %v636_v16, %v3639_v6 }
  0x97   :  { %v3130_v52 = vadd.f32 %v3129_v47, %v2739_v42  ;;  %v2751_v42 = vmul.f32 %v989_v32, %v301_v31  ;;  %v313_v31 = vunpack.c.h.bf16 %v78_v20  ;;  %v1037_v32 = vrot.slane %v637_v56, %v3648_v17  ;;  %v84_v20 = vld [vmem:[#allocation3 + $0x160] sm:$0xff] }
  0x99   :  { %v3131_v57 = vadd.f32 %v3130_v52, %v2740_v46  ;;  %v2752_v46 = vmul.f32 %v993_v36, %v302_v35  ;;  %v314_v35 = vunpack.c.l.bf16 %v79_v30  ;;  %v1041_v36 = vrot.slane %v637_v56, %v3652_v24 }
  0x9b   :  { %v3132_v61 = vadd.f32 %v3131_v57, %v2741_v51  ;;  %v2753_v51 = vmul.f32 %v997_v41, %v303_v37  ;;  %v638_v37 = vld [vmem:[#allocation6 + $0x50] sm:$0xff]  ;;  %v315_v41 = vunpack.c.h.bf16 %v79_v30 }
  0x9d   :  { %v3133_v4 = vadd.f32 %v3132_v61, %v2742_v55  ;;  %v2754_v55 = vmul.f32 %v1001_v45, %v304_v44  ;;  %v2755_v61 = vmul.f32 %v1005_v50, %v305_v49  ;;  %v316_v45 = vunpack.c.l.bf16 %v80_v40  ;;  %v81_v49 = vld [vmem:[#allocation3 + $0x148] sm:$0xff] }
  0x9e   :  { %v317_v50 = vunpack.c.h.bf16 %v80_v40 }
  0x9f   :  { %v3134_v11 = vadd.f32 %v3133_v4, %v2743_v60  ;;  %v1013_v60 = vrot.slane %v636_v16, %v3654_v27  ;;  %v2756_v4 = vmul.f32 %v1009_v54, %v306_v53  ;;  %v311_v16 = vunpack.c.h.bf16 %v77_v7  ;;  %v83_v7 = vld [vmem:[#allocation3 + $0x158] sm:$0xff] }
  0xa0   :  { %v318_v54 = vunpack.c.l.bf16 %v81_v49 }
  0xa1   :  { %v3135_v18 = vadd.f32 %v3134_v11, %v2744_v1  ;;  %v1017_v1 = vrot.slane %v637_v56, %v3635_v2  ;;  %v2757_v11 = vmul.f32 %v1013_v60, %v307_v59  ;;  %v82_v59 = vld [vmem:[#allocation3 + $0x150] sm:$0xff]  ;;  %v1061_v60 = vrot.slane %v638_v37, %v3641_v8 }
  0xa3   :  { %v3136_v23 = vadd.f32 %v3135_v18, %v2745_v10  ;;  %v1021_v10 = vrot.slane %v637_v56, %v3637_v3  ;;  %v2758_v18 = vmul.f32 %v1017_v1, %v308_v63  ;;  %v320_v63 = vunpack.c.l.bf16 %v82_v59 }
  0xa4   :  { %v1065_v1 = vrot.slane %v638_v37, %v3646_v15 }
  0xa5   :  { %v3137_v29 = vadd.f32 %v3136_v23, %v2746_v14  ;;  %v1025_v14 = vrot.slane %v637_v56, %v3639_v6 }
  0xa7   :  { %v3138_v34 = vadd.f32 %v3137_v29, %v2747_v22  ;;  %v2759_v22 = vmul.f32 %v1021_v10, %v309_v9  ;;  %v321_v9 = vunpack.c.h.bf16 %v82_v59  ;;  %v1069_v10 = vrot.slane %v638_v37, %v3648_v17  ;;  %v88_v59 = vld [vmem:[#allocation3 + $0x180] sm:$0xff] }
  0xa9   :  { %v3139_v39 = vadd.f32 %v3138_v34, %v2748_v28  ;;  %v2760_v28 = vmul.f32 %v1025_v14, %v310_v13  ;;  %v322_v13 = vunpack.c.l.bf16 %v83_v7  ;;  %v1073_v14 = vrot.slane %v638_v37, %v3652_v24 }
  0xab   :  { %v3140_v43 = vadd.f32 %v3139_v39, %v2749_v33  ;;  %v2761_v33 = vmul.f32 %v1029_v21, %v311_v16  ;;  %v639_v16 = vld [vmem:[#allocation6 + $0x58] sm:$0xff]  ;;  %v323_v21 = vunpack.c.h.bf16 %v83_v7 }
  0xad   :  { %v3141_v47 = vadd.f32 %v3140_v43, %v2750_v38  ;;  %v2762_v38 = vmul.f32 %v1033_v26, %v312_v25  ;;  %v2763_v43 = vmul.f32 %v1037_v32, %v313_v31  ;;  %v324_v26 = vunpack.c.l.bf16 %v84_v20  ;;  %v85_v31 = vld [vmem:[#allocation3 + $0x168] sm:$0xff] }
  0xae   :  { %v325_v32 = vunpack.c.h.bf16 %v84_v20 }
  0xaf   :  { %v3142_v52 = vadd.f32 %v3141_v47, %v2751_v42  ;;  %v1045_v42 = vrot.slane %v637_v56, %v3654_v27  ;;  %v2764_v47 = vmul.f32 %v1041_v36, %v314_v35  ;;  %v319_v56 = vunpack.c.h.bf16 %v81_v49  ;;  %v87_v49 = vld [vmem:[#allocation3 + $0x178] sm:$0xff] }
  0xb0   :  { %v326_v36 = vunpack.c.l.bf16 %v85_v31 }
  0xb1   :  { %v3143_v57 = vadd.f32 %v3142_v52, %v2752_v46  ;;  %v1049_v46 = vrot.slane %v638_v37, %v3635_v2  ;;  %v2765_v52 = vmul.f32 %v1045_v42, %v315_v41  ;;  %v86_v41 = vld [vmem:[#allocation3 + $0x170] sm:$0xff]  ;;  %v1093_v42 = vrot.slane %v639_v16, %v3641_v8 }
  0xb3   :  { %v3144_v62 = vadd.f32 %v3143_v57, %v2753_v51  ;;  %v1053_v51 = vrot.slane %v638_v37, %v3637_v3  ;;  %v2766_v57 = vmul.f32 %v1049_v46, %v316_v45  ;;  %v328_v45 = vunpack.c.l.bf16 %v86_v41 }
  0xb4   :  { %v1097_v46 = vrot.slane %v639_v16, %v3646_v15 }
  0xb5   :  { %v3145_v5 = vadd.f32 %v3144_v62, %v2754_v55  ;;  %v1057_v55 = vrot.slane %v638_v37, %v3639_v6 }
  0xb7   :  { %v3146_v12 = vadd.f32 %v3145_v5, %v2755_v61  ;;  %v2767_v61 = vmul.f32 %v1053_v51, %v317_v50  ;;  %v329_v50 = vunpack.c.h.bf16 %v86_v41  ;;  %v1101_v51 = vrot.slane %v639_v16, %v3648_v17  ;;  %v92_v41 = vld [vmem:[#allocation3 + $0x1a0] sm:$0xff] }
  0xb9   :  { %v3147_v19 = vadd.f32 %v3146_v12, %v2756_v4  ;;  %v2768_v4 = vmul.f32 %v1057_v55, %v318_v54  ;;  %v330_v54 = vunpack.c.l.bf16 %v87_v49  ;;  %v1105_v55 = vrot.slane %v639_v16, %v3652_v24 }
  0xbb   :  { %v3148_v23 = vadd.f32 %v3147_v19, %v2757_v11  ;;  %v2769_v11 = vmul.f32 %v1061_v60, %v319_v56  ;;  %v640_v56 = vld [vmem:[#allocation6 + $0x60] sm:$0xff]  ;;  %v331_v60 = vunpack.c.h.bf16 %v87_v49 }
  0xbd   :  { %v3149_v29 = vadd.f32 %v3148_v23, %v2758_v18  ;;  %v2770_v18 = vmul.f32 %v1065_v1, %v320_v63  ;;  %v2771_v23 = vmul.f32 %v1069_v10, %v321_v9  ;;  %v332_v1 = vunpack.c.l.bf16 %v88_v59  ;;  %v89_v9 = vld [vmem:[#allocation3 + $0x188] sm:$0xff] }
  0xbe   :  { %v333_v10 = vunpack.c.h.bf16 %v88_v59 }
  0xbf   :  { %v3150_v34 = vadd.f32 %v3149_v29, %v2759_v22  ;;  %v1077_v22 = vrot.slane %v638_v37, %v3654_v27  ;;  %v2772_v29 = vmul.f32 %v1073_v14, %v322_v13  ;;  %v327_v37 = vunpack.c.h.bf16 %v85_v31  ;;  %v91_v31 = vld [vmem:[#allocation3 + $0x198] sm:$0xff] }
  0xc0   :  { %v334_v14 = vunpack.c.l.bf16 %v89_v9 }
  0xc1   :  { %v3151_v39 = vadd.f32 %v3150_v34, %v2760_v28  ;;  %v1081_v28 = vrot.slane %v639_v16, %v3635_v2  ;;  %v2773_v34 = vmul.f32 %v1077_v22, %v323_v21  ;;  %v90_v21 = vld [vmem:[#allocation3 + $0x190] sm:$0xff]  ;;  %v1125_v22 = vrot.slane %v640_v56, %v3641_v8 }
  0xc3   :  { %v3152_v44 = vadd.f32 %v3151_v39, %v2761_v33  ;;  %v1085_v33 = vrot.slane %v639_v16, %v3637_v3  ;;  %v2774_v39 = vmul.f32 %v1081_v28, %v324_v26  ;;  %v336_v26 = vunpack.c.l.bf16 %v90_v21 }
  0xc4   :  { %v1129_v28 = vrot.slane %v640_v56, %v3646_v15 }
  0xc5   :  { %v3153_v48 = vadd.f32 %v3152_v44, %v2762_v38  ;;  %v1089_v38 = vrot.slane %v639_v16, %v3639_v6 }
  0xc7   :  { %v3154_v53 = vadd.f32 %v3153_v48, %v2763_v43  ;;  %v2775_v43 = vmul.f32 %v1085_v33, %v325_v32  ;;  %v337_v32 = vunpack.c.h.bf16 %v90_v21  ;;  %v1133_v33 = vrot.slane %v640_v56, %v3648_v17  ;;  %v96_v21 = vld [vmem:[#allocation3 + $0x1c0] sm:$0xff] }
  0xc9   :  { %v3155_v58 = vadd.f32 %v3154_v53, %v2764_v47  ;;  %v2776_v47 = vmul.f32 %v1089_v38, %v326_v36  ;;  %v338_v36 = vunpack.c.l.bf16 %v91_v31  ;;  %v1137_v38 = vrot.slane %v640_v56, %v3652_v24 }
  0xcb   :  { %v3156_v62 = vadd.f32 %v3155_v58, %v2765_v52  ;;  %v2777_v52 = vmul.f32 %v1093_v42, %v327_v37  ;;  %v641_v37 = vld [vmem:[#allocation6 + $0x68] sm:$0xff]  ;;  %v339_v42 = vunpack.c.h.bf16 %v91_v31 }
  0xcd   :  { %v3157_v5 = vadd.f32 %v3156_v62, %v2766_v57  ;;  %v2778_v57 = vmul.f32 %v1097_v46, %v328_v45  ;;  %v2779_v62 = vmul.f32 %v1101_v51, %v329_v50  ;;  %v340_v46 = vunpack.c.l.bf16 %v92_v41  ;;  %v93_v50 = vld [vmem:[#allocation3 + $0x1a8] sm:$0xff] }
  0xce   :  { %v341_v51 = vunpack.c.h.bf16 %v92_v41 }
  0xcf   :  { %v3158_v12 = vadd.f32 %v3157_v5, %v2767_v61  ;;  %v1109_v61 = vrot.slane %v639_v16, %v3654_v27  ;;  %v2780_v5 = vmul.f32 %v1105_v55, %v330_v54  ;;  %v335_v16 = vunpack.c.h.bf16 %v89_v9  ;;  %v95_v9 = vld [vmem:[#allocation3 + $0x1b8] sm:$0xff] }
  0xd0   :  { %v342_v55 = vunpack.c.l.bf16 %v93_v50 }
  0xd1   :  { %v3159_v19 = vadd.f32 %v3158_v12, %v2768_v4  ;;  %v1113_v4 = vrot.slane %v640_v56, %v3635_v2  ;;  %v2781_v12 = vmul.f32 %v1109_v61, %v331_v60  ;;  %v94_v60 = vld [vmem:[#allocation3 + $0x1b0] sm:$0xff]  ;;  %v1157_v61 = vrot.slane %v641_v37, %v3641_v8 }
  0xd3   :  { %v3160_v25 = vadd.f32 %v3159_v19, %v2769_v11  ;;  %v1117_v11 = vrot.slane %v640_v56, %v3637_v3  ;;  %v2782_v19 = vmul.f32 %v1113_v4, %v332_v1  ;;  %v344_v1 = vunpack.c.l.bf16 %v94_v60 }
  0xd4   :  { %v1161_v4 = vrot.slane %v641_v37, %v3646_v15 }
  0xd5   :  { %v3161_v30 = vadd.f32 %v3160_v25, %v2770_v18  ;;  %v1121_v18 = vrot.slane %v640_v56, %v3639_v6 }
  0xd7   :  { %v3162_v35 = vadd.f32 %v3161_v30, %v2771_v23  ;;  %v2783_v23 = vmul.f32 %v1117_v11, %v333_v10  ;;  %v345_v10 = vunpack.c.h.bf16 %v94_v60  ;;  %v1165_v11 = vrot.slane %v641_v37, %v3648_v17  ;;  %v100_v60 = vld [vmem:[#allocation3 + $0x1e0] sm:$0xff] }
  0xd9   :  { %v3163_v40 = vadd.f32 %v3162_v35, %v2772_v29  ;;  %v2784_v29 = vmul.f32 %v1121_v18, %v334_v14  ;;  %v346_v14 = vunpack.c.l.bf16 %v95_v9  ;;  %v1169_v18 = vrot.slane %v641_v37, %v3652_v24 }
  0xdb   :  { %v3164_v44 = vadd.f32 %v3163_v40, %v2773_v34  ;;  %v2785_v34 = vmul.f32 %v1125_v22, %v335_v16  ;;  %v642_v16 = vld [vmem:[#allocation6 + $0x70] sm:$0xff]  ;;  %v347_v22 = vunpack.c.h.bf16 %v95_v9 }
  0xdd   :  { %v3165_v48 = vadd.f32 %v3164_v44, %v2774_v39  ;;  %v2786_v39 = vmul.f32 %v1129_v28, %v336_v26  ;;  %v2787_v44 = vmul.f32 %v1133_v33, %v337_v32  ;;  %v348_v28 = vunpack.c.l.bf16 %v96_v21  ;;  %v97_v32 = vld [vmem:[#allocation3 + $0x1c8] sm:$0xff] }
  0xde   :  { %v349_v33 = vunpack.c.h.bf16 %v96_v21 }
  0xdf   :  { %v3166_v53 = vadd.f32 %v3165_v48, %v2775_v43  ;;  %v1141_v43 = vrot.slane %v640_v56, %v3654_v27  ;;  %v2788_v48 = vmul.f32 %v1137_v38, %v338_v36  ;;  %v343_v56 = vunpack.c.h.bf16 %v93_v50  ;;  %v99_v50 = vld [vmem:[#allocation3 + $0x1d8] sm:$0xff] }
  0xe0   :  { %v350_v38 = vunpack.c.l.bf16 %v97_v32 }
  0xe1   :  { %v3167_v58 = vadd.f32 %v3166_v53, %v2776_v47  ;;  %v1145_v47 = vrot.slane %v641_v37, %v3635_v2  ;;  %v2789_v53 = vmul.f32 %v1141_v43, %v339_v42  ;;  %v98_v42 = vld [vmem:[#allocation3 + $0x1d0] sm:$0xff]  ;;  %v1189_v43 = vrot.slane %v642_v16, %v3641_v8 }
  0xe3   :  { %v3168_v63 = vadd.f32 %v3167_v58, %v2777_v52  ;;  %v1149_v52 = vrot.slane %v641_v37, %v3637_v3  ;;  %v2790_v58 = vmul.f32 %v1145_v47, %v340_v46  ;;  %v352_v46 = vunpack.c.l.bf16 %v98_v42 }
  0xe4   :  { %v1193_v47 = vrot.slane %v642_v16, %v3646_v15 }
  0xe5   :  { %v3169_v7 = vadd.f32 %v3168_v63, %v2778_v57  ;;  %v1153_v57 = vrot.slane %v641_v37, %v3639_v6 }
  0xe7   :  { %v3170_v13 = vadd.f32 %v3169_v7, %v2779_v62  ;;  %v2791_v62 = vmul.f32 %v1149_v52, %v341_v51  ;;  %v353_v51 = vunpack.c.h.bf16 %v98_v42  ;;  %v1197_v52 = vrot.slane %v642_v16, %v3648_v17  ;;  %v104_v42 = vld [vmem:[#allocation3 + $0x200] sm:$0xff] }
  0xe9   :  { %v3171_v20 = vadd.f32 %v3170_v13, %v2780_v5  ;;  %v2792_v5 = vmul.f32 %v1153_v57, %v342_v55  ;;  %v354_v55 = vunpack.c.l.bf16 %v99_v50  ;;  %v1201_v57 = vrot.slane %v642_v16, %v3652_v24 }
  0xeb   :  { %v3172_v25 = vadd.f32 %v3171_v20, %v2781_v12  ;;  %v2793_v12 = vmul.f32 %v1157_v61, %v343_v56  ;;  %v643_v56 = vld [vmem:[#allocation6 + $0x78] sm:$0xff]  ;;  %v355_v61 = vunpack.c.h.bf16 %v99_v50 }
  0xed   :  { %v3173_v30 = vadd.f32 %v3172_v25, %v2782_v19  ;;  %v2794_v19 = vmul.f32 %v1161_v4, %v344_v1  ;;  %v2795_v25 = vmul.f32 %v1165_v11, %v345_v10  ;;  %v356_v4 = vunpack.c.l.bf16 %v100_v60  ;;  %v101_v10 = vld [vmem:[#allocation3 + $0x1e8] sm:$0xff] }
  0xee   :  { %v357_v11 = vunpack.c.h.bf16 %v100_v60 }
  0xef   :  { %v3174_v35 = vadd.f32 %v3173_v30, %v2783_v23  ;;  %v1173_v23 = vrot.slane %v641_v37, %v3654_v27  ;;  %v2796_v30 = vmul.f32 %v1169_v18, %v346_v14  ;;  %v351_v37 = vunpack.c.h.bf16 %v97_v32  ;;  %v103_v32 = vld [vmem:[#allocation3 + $0x1f8] sm:$0xff] }
  0xf0   :  { %v358_v18 = vunpack.c.l.bf16 %v101_v10 }
  0xf1   :  { %v3175_v40 = vadd.f32 %v3174_v35, %v2784_v29  ;;  %v1177_v29 = vrot.slane %v642_v16, %v3635_v2  ;;  %v2797_v35 = vmul.f32 %v1173_v23, %v347_v22  ;;  %v102_v22 = vld [vmem:[#allocation3 + $0x1f0] sm:$0xff]  ;;  %v1221_v23 = vrot.slane %v643_v56, %v3641_v8 }
  0xf3   :  { %v3176_v45 = vadd.f32 %v3175_v40, %v2785_v34  ;;  %v1181_v34 = vrot.slane %v642_v16, %v3637_v3  ;;  %v2798_v40 = vmul.f32 %v1177_v29, %v348_v28  ;;  %v360_v28 = vunpack.c.l.bf16 %v102_v22 }
  0xf4   :  { %v1225_v29 = vrot.slane %v643_v56, %v3646_v15 }
  0xf5   :  { %v3177_v49 = vadd.f32 %v3176_v45, %v2786_v39  ;;  %v1185_v39 = vrot.slane %v642_v16, %v3639_v6 }
  0xf7   :  { %v3178_v54 = vadd.f32 %v3177_v49, %v2787_v44  ;;  %v2799_v44 = vmul.f32 %v1181_v34, %v349_v33  ;;  %v361_v33 = vunpack.c.h.bf16 %v102_v22  ;;  %v1229_v34 = vrot.slane %v643_v56, %v3648_v17  ;;  %v108_v22 = vld [vmem:[#allocation3 + $0x220] sm:$0xff] }
  0xf9   :  { %v3179_v59 = vadd.f32 %v3178_v54, %v2788_v48  ;;  %v2800_v48 = vmul.f32 %v1185_v39, %v350_v38  ;;  %v362_v38 = vunpack.c.l.bf16 %v103_v32  ;;  %v1233_v39 = vrot.slane %v643_v56, %v3652_v24 }
  0xfb   :  { %v3180_v63 = vadd.f32 %v3179_v59, %v2789_v53  ;;  %v2801_v53 = vmul.f32 %v1189_v43, %v351_v37  ;;  %v644_v37 = vld [vmem:[#allocation6 + $0x80] sm:$0xff]  ;;  %v363_v43 = vunpack.c.h.bf16 %v103_v32 }
  0xfd   :  { %v3181_v7 = vadd.f32 %v3180_v63, %v2790_v58  ;;  %v2802_v58 = vmul.f32 %v1193_v47, %v352_v46  ;;  %v2803_v63 = vmul.f32 %v1197_v52, %v353_v51  ;;  %v364_v47 = vunpack.c.l.bf16 %v104_v42  ;;  %v105_v51 = vld [vmem:[#allocation3 + $0x208] sm:$0xff] }
  0xfe   :  { %v365_v52 = vunpack.c.h.bf16 %v104_v42 }
  0xff   :  { %v3182_v13 = vadd.f32 %v3181_v7, %v2791_v62  ;;  %v1205_v62 = vrot.slane %v642_v16, %v3654_v27  ;;  %v2804_v7 = vmul.f32 %v1201_v57, %v354_v55  ;;  %v359_v16 = vunpack.c.h.bf16 %v101_v10  ;;  %v107_v10 = vld [vmem:[#allocation3 + $0x218] sm:$0xff] }
 0x100   :  { %v366_v57 = vunpack.c.l.bf16 %v105_v51 }
 0x101   :  { %v3183_v20 = vadd.f32 %v3182_v13, %v2792_v5  ;;  %v1209_v5 = vrot.slane %v643_v56, %v3635_v2  ;;  %v2805_v13 = vmul.f32 %v1205_v62, %v355_v61  ;;  %v106_v61 = vld [vmem:[#allocation3 + $0x210] sm:$0xff]  ;;  %v1253_v62 = vrot.slane %v644_v37, %v3641_v8 }
 0x103   :  { %v3184_v26 = vadd.f32 %v3183_v20, %v2793_v12  ;;  %v1213_v12 = vrot.slane %v643_v56, %v3637_v3  ;;  %v2806_v20 = vmul.f32 %v1209_v5, %v356_v4  ;;  %v368_v4 = vunpack.c.l.bf16 %v106_v61 }
 0x104   :  { %v1257_v5 = vrot.slane %v644_v37, %v3646_v15 }
 0x105   :  { %v3185_v31 = vadd.f32 %v3184_v26, %v2794_v19  ;;  %v1217_v19 = vrot.slane %v643_v56, %v3639_v6 }
 0x107   :  { %v3186_v36 = vadd.f32 %v3185_v31, %v2795_v25  ;;  %v2807_v25 = vmul.f32 %v1213_v12, %v357_v11  ;;  %v369_v11 = vunpack.c.h.bf16 %v106_v61  ;;  %v1261_v12 = vrot.slane %v644_v37, %v3648_v17  ;;  %v112_v61 = vld [vmem:[#allocation3 + $0x240] sm:$0xff] }
 0x109   :  { %v3187_v41 = vadd.f32 %v3186_v36, %v2796_v30  ;;  %v2808_v30 = vmul.f32 %v1217_v19, %v358_v18  ;;  %v370_v18 = vunpack.c.l.bf16 %v107_v10  ;;  %v1265_v19 = vrot.slane %v644_v37, %v3652_v24 }
 0x10b   :  { %v3188_v45 = vadd.f32 %v3187_v41, %v2797_v35  ;;  %v2809_v35 = vmul.f32 %v1221_v23, %v359_v16  ;;  %v645_v16 = vld [vmem:[#allocation6 + $0x88] sm:$0xff]  ;;  %v371_v23 = vunpack.c.h.bf16 %v107_v10 }
 0x10d   :  { %v3189_v49 = vadd.f32 %v3188_v45, %v2798_v40  ;;  %v2810_v40 = vmul.f32 %v1225_v29, %v360_v28  ;;  %v2811_v45 = vmul.f32 %v1229_v34, %v361_v33  ;;  %v372_v29 = vunpack.c.l.bf16 %v108_v22  ;;  %v109_v33 = vld [vmem:[#allocation3 + $0x228] sm:$0xff] }
 0x10e   :  { %v373_v34 = vunpack.c.h.bf16 %v108_v22 }
 0x10f   :  { %v3190_v54 = vadd.f32 %v3189_v49, %v2799_v44  ;;  %v1237_v44 = vrot.slane %v643_v56, %v3654_v27  ;;  %v2812_v49 = vmul.f32 %v1233_v39, %v362_v38  ;;  %v367_v56 = vunpack.c.h.bf16 %v105_v51  ;;  %v111_v51 = vld [vmem:[#allocation3 + $0x238] sm:$0xff] }
 0x110   :  { %v374_v39 = vunpack.c.l.bf16 %v109_v33 }
 0x111   :  { %v3191_v59 = vadd.f32 %v3190_v54, %v2800_v48  ;;  %v1241_v48 = vrot.slane %v644_v37, %v3635_v2  ;;  %v2813_v54 = vmul.f32 %v1237_v44, %v363_v43  ;;  %v110_v43 = vld [vmem:[#allocation3 + $0x230] sm:$0xff]  ;;  %v1285_v44 = vrot.slane %v645_v16, %v3641_v8 }
 0x113   :  { %v3192_v1 = vadd.f32 %v3191_v59, %v2801_v53  ;;  %v1245_v53 = vrot.slane %v644_v37, %v3637_v3  ;;  %v2814_v59 = vmul.f32 %v1241_v48, %v364_v47  ;;  %v376_v47 = vunpack.c.l.bf16 %v110_v43 }
 0x114   :  { %v1289_v48 = vrot.slane %v645_v16, %v3646_v15 }
 0x115   :  { %v3193_v9 = vadd.f32 %v3192_v1, %v2802_v58  ;;  %v1249_v58 = vrot.slane %v644_v37, %v3639_v6 }
 0x117   :  { %v3194_v14 = vadd.f32 %v3193_v9, %v2803_v63  ;;  %v2815_v63 = vmul.f32 %v1245_v53, %v365_v52  ;;  %v377_v52 = vunpack.c.h.bf16 %v110_v43  ;;  %v1293_v53 = vrot.slane %v645_v16, %v3648_v17  ;;  %v116_v43 = vld [vmem:[#allocation3 + $0x260] sm:$0xff] }
 0x119   :  { %v3195_v21 = vadd.f32 %v3194_v14, %v2804_v7  ;;  %v2816_v7 = vmul.f32 %v1249_v58, %v366_v57  ;;  %v378_v57 = vunpack.c.l.bf16 %v111_v51  ;;  %v1297_v58 = vrot.slane %v645_v16, %v3652_v24 }
 0x11b   :  { %v3196_v26 = vadd.f32 %v3195_v21, %v2805_v13  ;;  %v2817_v13 = vmul.f32 %v1253_v62, %v367_v56  ;;  %v646_v56 = vld [vmem:[#allocation6 + $0x90] sm:$0xff]  ;;  %v379_v62 = vunpack.c.h.bf16 %v111_v51 }
 0x11d   :  { %v3197_v31 = vadd.f32 %v3196_v26, %v2806_v20  ;;  %v2818_v20 = vmul.f32 %v1257_v5, %v368_v4  ;;  %v2819_v26 = vmul.f32 %v1261_v12, %v369_v11  ;;  %v380_v5 = vunpack.c.l.bf16 %v112_v61  ;;  %v113_v11 = vld [vmem:[#allocation3 + $0x248] sm:$0xff] }
 0x11e   :  { %v381_v12 = vunpack.c.h.bf16 %v112_v61 }
 0x11f   :  { %v3198_v36 = vadd.f32 %v3197_v31, %v2807_v25  ;;  %v1269_v25 = vrot.slane %v644_v37, %v3654_v27  ;;  %v2820_v31 = vmul.f32 %v1265_v19, %v370_v18  ;;  %v375_v37 = vunpack.c.h.bf16 %v109_v33  ;;  %v115_v33 = vld [vmem:[#allocation3 + $0x258] sm:$0xff] }
 0x120   :  { %v382_v19 = vunpack.c.l.bf16 %v113_v11 }
 0x121   :  { %v3199_v41 = vadd.f32 %v3198_v36, %v2808_v30  ;;  %v1273_v30 = vrot.slane %v645_v16, %v3635_v2  ;;  %v2821_v36 = vmul.f32 %v1269_v25, %v371_v23  ;;  %v114_v23 = vld [vmem:[#allocation3 + $0x250] sm:$0xff]  ;;  %v1317_v25 = vrot.slane %v646_v56, %v3641_v8 }
 0x123   :  { %v3200_v46 = vadd.f32 %v3199_v41, %v2809_v35  ;;  %v1277_v35 = vrot.slane %v645_v16, %v3637_v3  ;;  %v2822_v41 = vmul.f32 %v1273_v30, %v372_v29  ;;  %v384_v29 = vunpack.c.l.bf16 %v114_v23 }
 0x124   :  { %v1321_v30 = vrot.slane %v646_v56, %v3646_v15 }
 0x125   :  { %v3201_v50 = vadd.f32 %v3200_v46, %v2810_v40  ;;  %v1281_v40 = vrot.slane %v645_v16, %v3639_v6 }
 0x127   :  { %v3202_v55 = vadd.f32 %v3201_v50, %v2811_v45  ;;  %v2823_v45 = vmul.f32 %v1277_v35, %v373_v34  ;;  %v385_v34 = vunpack.c.h.bf16 %v114_v23  ;;  %v1325_v35 = vrot.slane %v646_v56, %v3648_v17  ;;  %v120_v23 = vld [vmem:[#allocation3 + $0x280] sm:$0xff] }
 0x129   :  { %v3203_v60 = vadd.f32 %v3202_v55, %v2812_v49  ;;  %v2824_v49 = vmul.f32 %v1281_v40, %v374_v39  ;;  %v386_v39 = vunpack.c.l.bf16 %v115_v33  ;;  %v1329_v40 = vrot.slane %v646_v56, %v3652_v24 }
 0x12b   :  { %v3204_v1 = vadd.f32 %v3203_v60, %v2813_v54  ;;  %v2825_v54 = vmul.f32 %v1285_v44, %v375_v37  ;;  %v647_v37 = vld [vmem:[#allocation6 + $0x98] sm:$0xff]  ;;  %v387_v44 = vunpack.c.h.bf16 %v115_v33 }
 0x12d   :  { %v3205_v9 = vadd.f32 %v3204_v1, %v2814_v59  ;;  %v2826_v59 = vmul.f32 %v1289_v48, %v376_v47  ;;  %v2827_v1 = vmul.f32 %v1293_v53, %v377_v52  ;;  %v388_v48 = vunpack.c.l.bf16 %v116_v43  ;;  %v117_v52 = vld [vmem:[#allocation3 + $0x268] sm:$0xff] }
 0x12e   :  { %v389_v53 = vunpack.c.h.bf16 %v116_v43 }
 0x12f   :  { %v3206_v14 = vadd.f32 %v3205_v9, %v2815_v63  ;;  %v1301_v63 = vrot.slane %v645_v16, %v3654_v27  ;;  %v2828_v9 = vmul.f32 %v1297_v58, %v378_v57  ;;  %v383_v16 = vunpack.c.h.bf16 %v113_v11  ;;  %v119_v11 = vld [vmem:[#allocation3 + $0x278] sm:$0xff] }
 0x130   :  { %v390_v58 = vunpack.c.l.bf16 %v117_v52 }
 0x131   :  { %v3207_v21 = vadd.f32 %v3206_v14, %v2816_v7  ;;  %v1305_v7 = vrot.slane %v646_v56, %v3635_v2  ;;  %v2829_v14 = vmul.f32 %v1301_v63, %v379_v62  ;;  %v118_v62 = vld [vmem:[#allocation3 + $0x270] sm:$0xff]  ;;  %v1349_v63 = vrot.slane %v647_v37, %v3641_v8 }
 0x133   :  { %v3208_v28 = vadd.f32 %v3207_v21, %v2817_v13  ;;  %v1309_v13 = vrot.slane %v646_v56, %v3637_v3  ;;  %v2830_v21 = vmul.f32 %v1305_v7, %v380_v5  ;;  %v392_v5 = vunpack.c.l.bf16 %v118_v62 }
 0x134   :  { %v1353_v7 = vrot.slane %v647_v37, %v3646_v15 }
 0x135   :  { %v3209_v32 = vadd.f32 %v3208_v28, %v2818_v20  ;;  %v1313_v20 = vrot.slane %v646_v56, %v3639_v6 }
 0x137   :  { %v3210_v38 = vadd.f32 %v3209_v32, %v2819_v26  ;;  %v2831_v26 = vmul.f32 %v1309_v13, %v381_v12  ;;  %v393_v12 = vunpack.c.h.bf16 %v118_v62  ;;  %v1357_v13 = vrot.slane %v647_v37, %v3648_v17  ;;  %v124_v62 = vld [vmem:[#allocation3 + $0x2a0] sm:$0xff] }
 0x139   :  { %v3211_v42 = vadd.f32 %v3210_v38, %v2820_v31  ;;  %v2832_v31 = vmul.f32 %v1313_v20, %v382_v19  ;;  %v394_v19 = vunpack.c.l.bf16 %v119_v11  ;;  %v1361_v20 = vrot.slane %v647_v37, %v3652_v24 }
 0x13b   :  { %v3212_v46 = vadd.f32 %v3211_v42, %v2821_v36  ;;  %v2833_v36 = vmul.f32 %v1317_v25, %v383_v16  ;;  %v648_v16 = vld [vmem:[#allocation6 + $0xa0] sm:$0xff]  ;;  %v395_v25 = vunpack.c.h.bf16 %v119_v11 }
 0x13d   :  { %v3213_v50 = vadd.f32 %v3212_v46, %v2822_v41  ;;  %v2834_v41 = vmul.f32 %v1321_v30, %v384_v29  ;;  %v2835_v46 = vmul.f32 %v1325_v35, %v385_v34  ;;  %v396_v30 = vunpack.c.l.bf16 %v120_v23  ;;  %v121_v34 = vld [vmem:[#allocation3 + $0x288] sm:$0xff] }
 0x13e   :  { %v397_v35 = vunpack.c.h.bf16 %v120_v23 }
 0x13f   :  { %v3214_v55 = vadd.f32 %v3213_v50, %v2823_v45  ;;  %v1333_v45 = vrot.slane %v646_v56, %v3654_v27  ;;  %v2836_v50 = vmul.f32 %v1329_v40, %v386_v39  ;;  %v391_v56 = vunpack.c.h.bf16 %v117_v52  ;;  %v123_v52 = vld [vmem:[#allocation3 + $0x298] sm:$0xff] }
 0x140   :  { %v398_v40 = vunpack.c.l.bf16 %v121_v34 }
 0x141   :  { %v3215_v60 = vadd.f32 %v3214_v55, %v2824_v49  ;;  %v1337_v49 = vrot.slane %v647_v37, %v3635_v2  ;;  %v2837_v55 = vmul.f32 %v1333_v45, %v387_v44  ;;  %v122_v44 = vld [vmem:[#allocation3 + $0x290] sm:$0xff]  ;;  %v1381_v45 = vrot.slane %v648_v16, %v3641_v8 }
 0x143   :  { %v3216_v4 = vadd.f32 %v3215_v60, %v2825_v54  ;;  %v1341_v54 = vrot.slane %v647_v37, %v3637_v3  ;;  %v2838_v60 = vmul.f32 %v1337_v49, %v388_v48  ;;  %v400_v48 = vunpack.c.l.bf16 %v122_v44 }
 0x144   :  { %v1385_v49 = vrot.slane %v648_v16, %v3646_v15 }
 0x145   :  { %v3217_v10 = vadd.f32 %v3216_v4, %v2826_v59  ;;  %v1345_v59 = vrot.slane %v647_v37, %v3639_v6 }
 0x147   :  { %v3218_v18 = vadd.f32 %v3217_v10, %v2827_v1  ;;  %v2839_v1 = vmul.f32 %v1341_v54, %v389_v53  ;;  %v401_v53 = vunpack.c.h.bf16 %v122_v44  ;;  %v1389_v54 = vrot.slane %v648_v16, %v3648_v17  ;;  %v128_v44 = vld [vmem:[#allocation3 + $0x2c0] sm:$0xff] }
 0x149   :  { %v3219_v22 = vadd.f32 %v3218_v18, %v2828_v9  ;;  %v2840_v9 = vmul.f32 %v1345_v59, %v390_v58  ;;  %v402_v58 = vunpack.c.l.bf16 %v123_v52  ;;  %v1393_v59 = vrot.slane %v648_v16, %v3652_v24 }
 0x14b   :  { %v3220_v28 = vadd.f32 %v3219_v22, %v2829_v14  ;;  %v2841_v14 = vmul.f32 %v1349_v63, %v391_v56  ;;  %v649_v56 = vld [vmem:[#allocation6 + $0xa8] sm:$0xff]  ;;  %v403_v63 = vunpack.c.h.bf16 %v123_v52 }
 0x14d   :  { %v3221_v32 = vadd.f32 %v3220_v28, %v2830_v21  ;;  %v2842_v21 = vmul.f32 %v1353_v7, %v392_v5  ;;  %v2843_v28 = vmul.f32 %v1357_v13, %v393_v12  ;;  %v404_v7 = vunpack.c.l.bf16 %v124_v62  ;;  %v125_v12 = vld [vmem:[#allocation3 + $0x2a8] sm:$0xff] }
 0x14e   :  { %v405_v13 = vunpack.c.h.bf16 %v124_v62 }
 0x14f   :  { %v3222_v38 = vadd.f32 %v3221_v32, %v2831_v26  ;;  %v1365_v26 = vrot.slane %v647_v37, %v3654_v27  ;;  %v2844_v32 = vmul.f32 %v1361_v20, %v394_v19  ;;  %v399_v37 = vunpack.c.h.bf16 %v121_v34  ;;  %v127_v34 = vld [vmem:[#allocation3 + $0x2b8] sm:$0xff] }
 0x150   :  { %v406_v20 = vunpack.c.l.bf16 %v125_v12 }
 0x151   :  { %v3223_v42 = vadd.f32 %v3222_v38, %v2832_v31  ;;  %v1369_v31 = vrot.slane %v648_v16, %v3635_v2  ;;  %v2845_v38 = vmul.f32 %v1365_v26, %v395_v25  ;;  %v126_v25 = vld [vmem:[#allocation3 + $0x2b0] sm:$0xff]  ;;  %v1413_v26 = vrot.slane %v649_v56, %v3641_v8 }
 0x153   :  { %v3224_v47 = vadd.f32 %v3223_v42, %v2833_v36  ;;  %v1373_v36 = vrot.slane %v648_v16, %v3637_v3  ;;  %v2846_v42 = vmul.f32 %v1369_v31, %v396_v30  ;;  %v408_v30 = vunpack.c.l.bf16 %v126_v25 }
 0x154   :  { %v1417_v31 = vrot.slane %v649_v56, %v3646_v15 }
 0x155   :  { %v3225_v51 = vadd.f32 %v3224_v47, %v2834_v41  ;;  %v1377_v41 = vrot.slane %v648_v16, %v3639_v6 }
 0x157   :  { %v3226_v57 = vadd.f32 %v3225_v51, %v2835_v46  ;;  %v2847_v46 = vmul.f32 %v1373_v36, %v397_v35  ;;  %v409_v35 = vunpack.c.h.bf16 %v126_v25  ;;  %v1421_v36 = vrot.slane %v649_v56, %v3648_v17  ;;  %v132_v25 = vld [vmem:[#allocation3 + $0x2e0] sm:$0xff] }
 0x159   :  { %v3227_v61 = vadd.f32 %v3226_v57, %v2836_v50  ;;  %v2848_v50 = vmul.f32 %v1377_v41, %v398_v40  ;;  %v410_v40 = vunpack.c.l.bf16 %v127_v34  ;;  %v1425_v41 = vrot.slane %v649_v56, %v3652_v24 }
 0x15b   :  { %v3228_v4 = vadd.f32 %v3227_v61, %v2837_v55  ;;  %v2849_v55 = vmul.f32 %v1381_v45, %v399_v37  ;;  %v650_v37 = vld [vmem:[#allocation6 + $0xb0] sm:$0xff]  ;;  %v411_v45 = vunpack.c.h.bf16 %v127_v34 }
 0x15d   :  { %v3229_v10 = vadd.f32 %v3228_v4, %v2838_v60  ;;  %v2850_v60 = vmul.f32 %v1385_v49, %v400_v48  ;;  %v2851_v4 = vmul.f32 %v1389_v54, %v401_v53  ;;  %v412_v49 = vunpack.c.l.bf16 %v128_v44  ;;  %v129_v53 = vld [vmem:[#allocation3 + $0x2c8] sm:$0xff] }
 0x15e   :  { %v413_v54 = vunpack.c.h.bf16 %v128_v44 }
 0x15f   :  { %v3230_v18 = vadd.f32 %v3229_v10, %v2839_v1  ;;  %v1397_v1 = vrot.slane %v648_v16, %v3654_v27  ;;  %v2852_v10 = vmul.f32 %v1393_v59, %v402_v58  ;;  %v407_v16 = vunpack.c.h.bf16 %v125_v12  ;;  %v131_v12 = vld [vmem:[#allocation3 + $0x2d8] sm:$0xff] }
 0x160   :  { %v414_v59 = vunpack.c.l.bf16 %v129_v53 }
 0x161   :  { %v3231_v22 = vadd.f32 %v3230_v18, %v2840_v9  ;;  %v1401_v9 = vrot.slane %v649_v56, %v3635_v2  ;;  %v2853_v18 = vmul.f32 %v1397_v1, %v403_v63  ;;  %v130_v63 = vld [vmem:[#allocation3 + $0x2d0] sm:$0xff]  ;;  %v1445_v1 = vrot.slane %v650_v37, %v3641_v8 }
 0x163   :  { %v3232_v29 = vadd.f32 %v3231_v22, %v2841_v14  ;;  %v1405_v14 = vrot.slane %v649_v56, %v3637_v3  ;;  %v2854_v22 = vmul.f32 %v1401_v9, %v404_v7  ;;  %v416_v7 = vunpack.c.l.bf16 %v130_v63 }
 0x164   :  { %v1449_v9 = vrot.slane %v650_v37, %v3646_v15 }
 0x165   :  { %v3233_v33 = vadd.f32 %v3232_v29, %v2842_v21  ;;  %v1409_v21 = vrot.slane %v649_v56, %v3639_v6 }
 0x167   :  { %v3234_v39 = vadd.f32 %v3233_v33, %v2843_v28  ;;  %v2855_v28 = vmul.f32 %v1405_v14, %v405_v13  ;;  %v417_v13 = vunpack.c.h.bf16 %v130_v63  ;;  %v1453_v14 = vrot.slane %v650_v37, %v3648_v17  ;;  %v136_v63 = vld [vmem:[#allocation3 + $0x300] sm:$0xff] }
 0x169   :  { %v3235_v43 = vadd.f32 %v3234_v39, %v2844_v32  ;;  %v2856_v32 = vmul.f32 %v1409_v21, %v406_v20  ;;  %v418_v20 = vunpack.c.l.bf16 %v131_v12  ;;  %v1457_v21 = vrot.slane %v650_v37, %v3652_v24 }
 0x16b   :  { %v3236_v47 = vadd.f32 %v3235_v43, %v2845_v38  ;;  %v2857_v38 = vmul.f32 %v1413_v26, %v407_v16  ;;  %v651_v16 = vld [vmem:[#allocation6 + $0xb8] sm:$0xff]  ;;  %v419_v26 = vunpack.c.h.bf16 %v131_v12 }
 0x16d   :  { %v3237_v51 = vadd.f32 %v3236_v47, %v2846_v42  ;;  %v2858_v42 = vmul.f32 %v1417_v31, %v408_v30  ;;  %v2859_v47 = vmul.f32 %v1421_v36, %v409_v35  ;;  %v420_v31 = vunpack.c.l.bf16 %v132_v25  ;;  %v133_v35 = vld [vmem:[#allocation3 + $0x2e8] sm:$0xff] }
 0x16e   :  { %v421_v36 = vunpack.c.h.bf16 %v132_v25 }
 0x16f   :  { %v3238_v57 = vadd.f32 %v3237_v51, %v2847_v46  ;;  %v1429_v46 = vrot.slane %v649_v56, %v3654_v27  ;;  %v2860_v51 = vmul.f32 %v1425_v41, %v410_v40  ;;  %v415_v56 = vunpack.c.h.bf16 %v129_v53  ;;  %v135_v53 = vld [vmem:[#allocation3 + $0x2f8] sm:$0xff] }
 0x170   :  { %v422_v41 = vunpack.c.l.bf16 %v133_v35 }
 0x171   :  { %v3239_v61 = vadd.f32 %v3238_v57, %v2848_v50  ;;  %v1433_v50 = vrot.slane %v650_v37, %v3635_v2  ;;  %v2861_v57 = vmul.f32 %v1429_v46, %v411_v45  ;;  %v134_v45 = vld [vmem:[#allocation3 + $0x2f0] sm:$0xff]  ;;  %v1477_v46 = vrot.slane %v651_v16, %v3641_v8 }
 0x173   :  { %v3240_v5 = vadd.f32 %v3239_v61, %v2849_v55  ;;  %v1437_v55 = vrot.slane %v650_v37, %v3637_v3  ;;  %v2862_v61 = vmul.f32 %v1433_v50, %v412_v49  ;;  %v424_v49 = vunpack.c.l.bf16 %v134_v45 }
 0x174   :  { %v1481_v50 = vrot.slane %v651_v16, %v3646_v15 }
 0x175   :  { %v3241_v11 = vadd.f32 %v3240_v5, %v2850_v60  ;;  %v1441_v60 = vrot.slane %v650_v37, %v3639_v6 }
 0x177   :  { %v3242_v19 = vadd.f32 %v3241_v11, %v2851_v4  ;;  %v2863_v4 = vmul.f32 %v1437_v55, %v413_v54  ;;  %v425_v54 = vunpack.c.h.bf16 %v134_v45  ;;  %v1485_v55 = vrot.slane %v651_v16, %v3648_v17  ;;  %v140_v45 = vld [vmem:[#allocation3 + $0x320] sm:$0xff] }
 0x179   :  { %v3243_v23 = vadd.f32 %v3242_v19, %v2852_v10  ;;  %v2864_v10 = vmul.f32 %v1441_v60, %v414_v59  ;;  %v426_v59 = vunpack.c.l.bf16 %v135_v53  ;;  %v1489_v60 = vrot.slane %v651_v16, %v3652_v24 }
 0x17b   :  { %v3244_v29 = vadd.f32 %v3243_v23, %v2853_v18  ;;  %v2865_v18 = vmul.f32 %v1445_v1, %v415_v56  ;;  %v652_v56 = vld [vmem:[#allocation6 + $0xc0] sm:$0xff]  ;;  %v427_v1 = vunpack.c.h.bf16 %v135_v53 }
 0x17d   :  { %v3245_v33 = vadd.f32 %v3244_v29, %v2854_v22  ;;  %v2866_v22 = vmul.f32 %v1449_v9, %v416_v7  ;;  %v2867_v29 = vmul.f32 %v1453_v14, %v417_v13  ;;  %v428_v9 = vunpack.c.l.bf16 %v136_v63  ;;  %v137_v13 = vld [vmem:[#allocation3 + $0x308] sm:$0xff] }
 0x17e   :  { %v429_v14 = vunpack.c.h.bf16 %v136_v63 }
 0x17f   :  { %v3246_v39 = vadd.f32 %v3245_v33, %v2855_v28  ;;  %v1461_v28 = vrot.slane %v650_v37, %v3654_v27  ;;  %v2868_v33 = vmul.f32 %v1457_v21, %v418_v20  ;;  %v423_v37 = vunpack.c.h.bf16 %v133_v35  ;;  %v139_v35 = vld [vmem:[#allocation3 + $0x318] sm:$0xff] }
 0x180   :  { %v430_v21 = vunpack.c.l.bf16 %v137_v13 }
 0x181   :  { %v3247_v43 = vadd.f32 %v3246_v39, %v2856_v32  ;;  %v1465_v32 = vrot.slane %v651_v16, %v3635_v2  ;;  %v2869_v39 = vmul.f32 %v1461_v28, %v419_v26  ;;  %v138_v26 = vld [vmem:[#allocation3 + $0x310] sm:$0xff]  ;;  %v1509_v28 = vrot.slane %v652_v56, %v3641_v8 }
 0x183   :  { %v3248_v48 = vadd.f32 %v3247_v43, %v2857_v38  ;;  %v1469_v38 = vrot.slane %v651_v16, %v3637_v3  ;;  %v2870_v43 = vmul.f32 %v1465_v32, %v420_v31  ;;  %v432_v31 = vunpack.c.l.bf16 %v138_v26 }
 0x184   :  { %v1513_v32 = vrot.slane %v652_v56, %v3646_v15 }
 0x185   :  { %v3249_v52 = vadd.f32 %v3248_v48, %v2858_v42  ;;  %v1473_v42 = vrot.slane %v651_v16, %v3639_v6 }
 0x187   :  { %v3250_v58 = vadd.f32 %v3249_v52, %v2859_v47  ;;  %v2871_v47 = vmul.f32 %v1469_v38, %v421_v36  ;;  %v433_v36 = vunpack.c.h.bf16 %v138_v26  ;;  %v1517_v38 = vrot.slane %v652_v56, %v3648_v17  ;;  %v144_v26 = vld [vmem:[#allocation3 + $0x340] sm:$0xff] }
 0x189   :  { %v3251_v62 = vadd.f32 %v3250_v58, %v2860_v51  ;;  %v2872_v51 = vmul.f32 %v1473_v42, %v422_v41  ;;  %v434_v41 = vunpack.c.l.bf16 %v139_v35  ;;  %v1521_v42 = vrot.slane %v652_v56, %v3652_v24 }
 0x18b   :  { %v3252_v5 = vadd.f32 %v3251_v62, %v2861_v57  ;;  %v2873_v57 = vmul.f32 %v1477_v46, %v423_v37  ;;  %v653_v37 = vld [vmem:[#allocation6 + $0xc8] sm:$0xff]  ;;  %v435_v46 = vunpack.c.h.bf16 %v139_v35 }
 0x18d   :  { %v3253_v11 = vadd.f32 %v3252_v5, %v2862_v61  ;;  %v2874_v61 = vmul.f32 %v1481_v50, %v424_v49  ;;  %v2875_v5 = vmul.f32 %v1485_v55, %v425_v54  ;;  %v436_v50 = vunpack.c.l.bf16 %v140_v45  ;;  %v141_v54 = vld [vmem:[#allocation3 + $0x328] sm:$0xff] }
 0x18e   :  { %v437_v55 = vunpack.c.h.bf16 %v140_v45 }
 0x18f   :  { %v3254_v19 = vadd.f32 %v3253_v11, %v2863_v4  ;;  %v1493_v4 = vrot.slane %v651_v16, %v3654_v27  ;;  %v2876_v11 = vmul.f32 %v1489_v60, %v426_v59  ;;  %v431_v16 = vunpack.c.h.bf16 %v137_v13  ;;  %v143_v13 = vld [vmem:[#allocation3 + $0x338] sm:$0xff] }
 0x190   :  { %v438_v60 = vunpack.c.l.bf16 %v141_v54 }
 0x191   :  { %v3255_v23 = vadd.f32 %v3254_v19, %v2864_v10  ;;  %v1497_v10 = vrot.slane %v652_v56, %v3635_v2  ;;  %v2877_v19 = vmul.f32 %v1493_v4, %v427_v1  ;;  %v142_v1 = vld [vmem:[#allocation3 + $0x330] sm:$0xff]  ;;  %v1541_v4 = vrot.slane %v653_v37, %v3641_v8 }
 0x193   :  { %v3256_v30 = vadd.f32 %v3255_v23, %v2865_v18  ;;  %v1501_v18 = vrot.slane %v652_v56, %v3637_v3  ;;  %v2878_v23 = vmul.f32 %v1497_v10, %v428_v9  ;;  %v440_v9 = vunpack.c.l.bf16 %v142_v1 }
 0x194   :  { %v1545_v10 = vrot.slane %v653_v37, %v3646_v15 }
 0x195   :  { %v3257_v34 = vadd.f32 %v3256_v30, %v2866_v22  ;;  %v1505_v22 = vrot.slane %v652_v56, %v3639_v6 }
 0x197   :  { %v3258_v40 = vadd.f32 %v3257_v34, %v2867_v29  ;;  %v2879_v29 = vmul.f32 %v1501_v18, %v429_v14  ;;  %v441_v14 = vunpack.c.h.bf16 %v142_v1  ;;  %v1549_v18 = vrot.slane %v653_v37, %v3648_v17  ;;  %v148_v1 = vld [vmem:[#allocation3 + $0x360] sm:$0xff] }
 0x199   :  { %v3259_v44 = vadd.f32 %v3258_v40, %v2868_v33  ;;  %v2880_v33 = vmul.f32 %v1505_v22, %v430_v21  ;;  %v442_v21 = vunpack.c.l.bf16 %v143_v13  ;;  %v1553_v22 = vrot.slane %v653_v37, %v3652_v24 }
 0x19b   :  { %v3260_v48 = vadd.f32 %v3259_v44, %v2869_v39  ;;  %v2881_v39 = vmul.f32 %v1509_v28, %v431_v16  ;;  %v654_v16 = vld [vmem:[#allocation6 + $0xd0] sm:$0xff]  ;;  %v443_v28 = vunpack.c.h.bf16 %v143_v13 }
 0x19d   :  { %v3261_v52 = vadd.f32 %v3260_v48, %v2870_v43  ;;  %v2882_v43 = vmul.f32 %v1513_v32, %v432_v31  ;;  %v2883_v48 = vmul.f32 %v1517_v38, %v433_v36  ;;  %v444_v32 = vunpack.c.l.bf16 %v144_v26  ;;  %v145_v36 = vld [vmem:[#allocation3 + $0x348] sm:$0xff] }
 0x19e   :  { %v445_v38 = vunpack.c.h.bf16 %v144_v26 }
 0x19f   :  { %v3262_v58 = vadd.f32 %v3261_v52, %v2871_v47  ;;  %v1525_v47 = vrot.slane %v652_v56, %v3654_v27  ;;  %v2884_v52 = vmul.f32 %v1521_v42, %v434_v41  ;;  %v439_v56 = vunpack.c.h.bf16 %v141_v54  ;;  %v147_v54 = vld [vmem:[#allocation3 + $0x358] sm:$0xff] }
 0x1a0   :  { %v446_v42 = vunpack.c.l.bf16 %v145_v36 }
 0x1a1   :  { %v3263_v62 = vadd.f32 %v3262_v58, %v2872_v51  ;;  %v1529_v51 = vrot.slane %v653_v37, %v3635_v2  ;;  %v2885_v58 = vmul.f32 %v1525_v47, %v435_v46  ;;  %v146_v46 = vld [vmem:[#allocation3 + $0x350] sm:$0xff]  ;;  %v1573_v47 = vrot.slane %v654_v16, %v3641_v8 }
 0x1a3   :  { %v3264_v7 = vadd.f32 %v3263_v62, %v2873_v57  ;;  %v1533_v57 = vrot.slane %v653_v37, %v3637_v3  ;;  %v2886_v62 = vmul.f32 %v1529_v51, %v436_v50  ;;  %v448_v50 = vunpack.c.l.bf16 %v146_v46 }
 0x1a4   :  { %v1577_v51 = vrot.slane %v654_v16, %v3646_v15 }
 0x1a5   :  { %v3265_v12 = vadd.f32 %v3264_v7, %v2874_v61  ;;  %v1537_v61 = vrot.slane %v653_v37, %v3639_v6 }
 0x1a7   :  { %v3266_v20 = vadd.f32 %v3265_v12, %v2875_v5  ;;  %v2887_v5 = vmul.f32 %v1533_v57, %v437_v55  ;;  %v449_v55 = vunpack.c.h.bf16 %v146_v46  ;;  %v1581_v57 = vrot.slane %v654_v16, %v3648_v17  ;;  %v152_v46 = vld [vmem:[#allocation3 + $0x380] sm:$0xff] }
 0x1a9   :  { %v3267_v25 = vadd.f32 %v3266_v20, %v2876_v11  ;;  %v2888_v11 = vmul.f32 %v1537_v61, %v438_v60  ;;  %v450_v60 = vunpack.c.l.bf16 %v147_v54  ;;  %v1585_v61 = vrot.slane %v654_v16, %v3652_v24 }
 0x1ab   :  { %v3268_v30 = vadd.f32 %v3267_v25, %v2877_v19  ;;  %v2889_v19 = vmul.f32 %v1541_v4, %v439_v56  ;;  %v655_v56 = vld [vmem:[#allocation6 + $0xd8] sm:$0xff]  ;;  %v451_v4 = vunpack.c.h.bf16 %v147_v54 }
 0x1ad   :  { %v3269_v34 = vadd.f32 %v3268_v30, %v2878_v23  ;;  %v2890_v23 = vmul.f32 %v1545_v10, %v440_v9  ;;  %v2891_v30 = vmul.f32 %v1549_v18, %v441_v14  ;;  %v452_v10 = vunpack.c.l.bf16 %v148_v1  ;;  %v149_v14 = vld [vmem:[#allocation3 + $0x368] sm:$0xff] }
 0x1ae   :  { %v453_v18 = vunpack.c.h.bf16 %v148_v1 }
 0x1af   :  { %v3270_v40 = vadd.f32 %v3269_v34, %v2879_v29  ;;  %v1557_v29 = vrot.slane %v653_v37, %v3654_v27  ;;  %v2892_v34 = vmul.f32 %v1553_v22, %v442_v21  ;;  %v447_v37 = vunpack.c.h.bf16 %v145_v36  ;;  %v151_v36 = vld [vmem:[#allocation3 + $0x378] sm:$0xff] }
 0x1b0   :  { %v454_v22 = vunpack.c.l.bf16 %v149_v14 }
 0x1b1   :  { %v3271_v44 = vadd.f32 %v3270_v40, %v2880_v33  ;;  %v1561_v33 = vrot.slane %v654_v16, %v3635_v2  ;;  %v2893_v40 = vmul.f32 %v1557_v29, %v443_v28  ;;  %v150_v28 = vld [vmem:[#allocation3 + $0x370] sm:$0xff]  ;;  %v1605_v29 = vrot.slane %v655_v56, %v3641_v8 }
 0x1b3   :  { %v3272_v49 = vadd.f32 %v3271_v44, %v2881_v39  ;;  %v1565_v39 = vrot.slane %v654_v16, %v3637_v3  ;;  %v2894_v44 = vmul.f32 %v1561_v33, %v444_v32  ;;  %v456_v32 = vunpack.c.l.bf16 %v150_v28 }
 0x1b4   :  { %v1609_v33 = vrot.slane %v655_v56, %v3646_v15 }
 0x1b5   :  { %v3273_v53 = vadd.f32 %v3272_v49, %v2882_v43  ;;  %v1569_v43 = vrot.slane %v654_v16, %v3639_v6 }
 0x1b7   :  { %v3274_v59 = vadd.f32 %v3273_v53, %v2883_v48  ;;  %v2895_v48 = vmul.f32 %v1565_v39, %v445_v38  ;;  %v457_v38 = vunpack.c.h.bf16 %v150_v28  ;;  %v1613_v39 = vrot.slane %v655_v56, %v3648_v17  ;;  %v156_v28 = vld [vmem:[#allocation3 + $0x3a0] sm:$0xff] }
 0x1b9   :  { %v3275_v63 = vadd.f32 %v3274_v59, %v2884_v52  ;;  %v2896_v52 = vmul.f32 %v1569_v43, %v446_v42  ;;  %v458_v42 = vunpack.c.l.bf16 %v151_v36  ;;  %v1617_v43 = vrot.slane %v655_v56, %v3652_v24 }
 0x1bb   :  { %v3276_v7 = vadd.f32 %v3275_v63, %v2885_v58  ;;  %v2897_v58 = vmul.f32 %v1573_v47, %v447_v37  ;;  %v656_v37 = vld [vmem:[#allocation6 + $0xe0] sm:$0xff]  ;;  %v459_v47 = vunpack.c.h.bf16 %v151_v36 }
 0x1bd   :  { %v3277_v12 = vadd.f32 %v3276_v7, %v2886_v62  ;;  %v2898_v62 = vmul.f32 %v1577_v51, %v448_v50  ;;  %v2899_v7 = vmul.f32 %v1581_v57, %v449_v55  ;;  %v460_v51 = vunpack.c.l.bf16 %v152_v46  ;;  %v153_v55 = vld [vmem:[#allocation3 + $0x388] sm:$0xff] }
 0x1be   :  { %v461_v57 = vunpack.c.h.bf16 %v152_v46 }
 0x1bf   :  { %v3278_v20 = vadd.f32 %v3277_v12, %v2887_v5  ;;  %v1589_v5 = vrot.slane %v654_v16, %v3654_v27  ;;  %v2900_v12 = vmul.f32 %v1585_v61, %v450_v60  ;;  %v455_v16 = vunpack.c.h.bf16 %v149_v14  ;;  %v155_v14 = vld [vmem:[#allocation3 + $0x398] sm:$0xff] }
 0x1c0   :  { %v462_v61 = vunpack.c.l.bf16 %v153_v55 }
 0x1c1   :  { %v3279_v25 = vadd.f32 %v3278_v20, %v2888_v11  ;;  %v1593_v11 = vrot.slane %v655_v56, %v3635_v2  ;;  %v2901_v20 = vmul.f32 %v1589_v5, %v451_v4  ;;  %v154_v4 = vld [vmem:[#allocation3 + $0x390] sm:$0xff]  ;;  %v1637_v5 = vrot.slane %v656_v37, %v3641_v8 }
 0x1c3   :  { %v3280_v31 = vadd.f32 %v3279_v25, %v2889_v19  ;;  %v1597_v19 = vrot.slane %v655_v56, %v3637_v3  ;;  %v2902_v25 = vmul.f32 %v1593_v11, %v452_v10  ;;  %v464_v10 = vunpack.c.l.bf16 %v154_v4 }
 0x1c4   :  { %v1641_v11 = vrot.slane %v656_v37, %v3646_v15 }
 0x1c5   :  { %v3281_v35 = vadd.f32 %v3280_v31, %v2890_v23  ;;  %v1601_v23 = vrot.slane %v655_v56, %v3639_v6 }
 0x1c7   :  { %v3282_v41 = vadd.f32 %v3281_v35, %v2891_v30  ;;  %v2903_v30 = vmul.f32 %v1597_v19, %v453_v18  ;;  %v465_v18 = vunpack.c.h.bf16 %v154_v4  ;;  %v1645_v19 = vrot.slane %v656_v37, %v3648_v17  ;;  %v160_v4 = vld [vmem:[#allocation3 + $0x3c0] sm:$0xff] }
 0x1c9   :  { %v3283_v45 = vadd.f32 %v3282_v41, %v2892_v34  ;;  %v2904_v34 = vmul.f32 %v1601_v23, %v454_v22  ;;  %v466_v22 = vunpack.c.l.bf16 %v155_v14  ;;  %v1649_v23 = vrot.slane %v656_v37, %v3652_v24 }
 0x1cb   :  { %v3284_v49 = vadd.f32 %v3283_v45, %v2893_v40  ;;  %v2905_v40 = vmul.f32 %v1605_v29, %v455_v16  ;;  %v657_v16 = vld [vmem:[#allocation6 + $0xe8] sm:$0xff]  ;;  %v467_v29 = vunpack.c.h.bf16 %v155_v14 }
 0x1cd   :  { %v3285_v53 = vadd.f32 %v3284_v49, %v2894_v44  ;;  %v2906_v44 = vmul.f32 %v1609_v33, %v456_v32  ;;  %v2907_v49 = vmul.f32 %v1613_v39, %v457_v38  ;;  %v468_v33 = vunpack.c.l.bf16 %v156_v28  ;;  %v157_v38 = vld [vmem:[#allocation3 + $0x3a8] sm:$0xff] }
 0x1ce   :  { %v469_v39 = vunpack.c.h.bf16 %v156_v28 }
 0x1cf   :  { %v3286_v59 = vadd.f32 %v3285_v53, %v2895_v48  ;;  %v1621_v48 = vrot.slane %v655_v56, %v3654_v27  ;;  %v2908_v53 = vmul.f32 %v1617_v43, %v458_v42  ;;  %v463_v56 = vunpack.c.h.bf16 %v153_v55  ;;  %v159_v55 = vld [vmem:[#allocation3 + $0x3b8] sm:$0xff] }
 0x1d0   :  { %v470_v43 = vunpack.c.l.bf16 %v157_v38 }
 0x1d1   :  { %v3287_v63 = vadd.f32 %v3286_v59, %v2896_v52  ;;  %v1625_v52 = vrot.slane %v656_v37, %v3635_v2  ;;  %v2909_v59 = vmul.f32 %v1621_v48, %v459_v47  ;;  %v158_v47 = vld [vmem:[#allocation3 + $0x3b0] sm:$0xff]  ;;  %v1669_v48 = vrot.slane %v657_v16, %v3641_v8 }
 0x1d3   :  { %v3288_v9 = vadd.f32 %v3287_v63, %v2897_v58  ;;  %v1629_v58 = vrot.slane %v656_v37, %v3637_v3  ;;  %v2910_v63 = vmul.f32 %v1625_v52, %v460_v51  ;;  %v472_v51 = vunpack.c.l.bf16 %v158_v47 }
 0x1d4   :  { %v1673_v52 = vrot.slane %v657_v16, %v3646_v15 }
 0x1d5   :  { %v3289_v13 = vadd.f32 %v3288_v9, %v2898_v62  ;;  %v1633_v62 = vrot.slane %v656_v37, %v3639_v6 }
 0x1d7   :  { %v3290_v21 = vadd.f32 %v3289_v13, %v2899_v7  ;;  %v2911_v7 = vmul.f32 %v1629_v58, %v461_v57  ;;  %v473_v57 = vunpack.c.h.bf16 %v158_v47  ;;  %v1677_v58 = vrot.slane %v657_v16, %v3648_v17  ;;  %v164_v47 = vld [vmem:[#allocation3 + $0x3e0] sm:$0xff] }
 0x1d9   :  { %v3291_v26 = vadd.f32 %v3290_v21, %v2900_v12  ;;  %v2912_v12 = vmul.f32 %v1633_v62, %v462_v61  ;;  %v474_v61 = vunpack.c.l.bf16 %v159_v55  ;;  %v1681_v62 = vrot.slane %v657_v16, %v3652_v24 }
 0x1db   :  { %v3292_v31 = vadd.f32 %v3291_v26, %v2901_v20  ;;  %v2913_v20 = vmul.f32 %v1637_v5, %v463_v56  ;;  %v658_v56 = vld [vmem:[#allocation6 + $0xf0] sm:$0xff]  ;;  %v475_v5 = vunpack.c.h.bf16 %v159_v55 }
 0x1dd   :  { %v3293_v35 = vadd.f32 %v3292_v31, %v2902_v25  ;;  %v2914_v25 = vmul.f32 %v1641_v11, %v464_v10  ;;  %v2915_v31 = vmul.f32 %v1645_v19, %v465_v18  ;;  %v476_v11 = vunpack.c.l.bf16 %v160_v4  ;;  %v161_v18 = vld [vmem:[#allocation3 + $0x3c8] sm:$0xff] }
 0x1de   :  { %v477_v19 = vunpack.c.h.bf16 %v160_v4 }
 0x1df   :  { %v3294_v41 = vadd.f32 %v3293_v35, %v2903_v30  ;;  %v1653_v30 = vrot.slane %v656_v37, %v3654_v27  ;;  %v2916_v35 = vmul.f32 %v1649_v23, %v466_v22  ;;  %v471_v37 = vunpack.c.h.bf16 %v157_v38  ;;  %v163_v38 = vld [vmem:[#allocation3 + $0x3d8] sm:$0xff] }
 0x1e0   :  { %v478_v23 = vunpack.c.l.bf16 %v161_v18 }
 0x1e1   :  { %v3295_v45 = vadd.f32 %v3294_v41, %v2904_v34  ;;  %v1657_v34 = vrot.slane %v657_v16, %v3635_v2  ;;  %v2917_v41 = vmul.f32 %v1653_v30, %v467_v29  ;;  %v162_v29 = vld [vmem:[#allocation3 + $0x3d0] sm:$0xff]  ;;  %v1701_v30 = vrot.slane %v658_v56, %v3641_v8 }
 0x1e3   :  { %v3296_v50 = vadd.f32 %v3295_v45, %v2905_v40  ;;  %v1661_v40 = vrot.slane %v657_v16, %v3637_v3  ;;  %v2918_v45 = vmul.f32 %v1657_v34, %v468_v33  ;;  %v480_v33 = vunpack.c.l.bf16 %v162_v29 }
 0x1e4   :  { %v1705_v34 = vrot.slane %v658_v56, %v3646_v15 }
 0x1e5   :  { %v3297_v54 = vadd.f32 %v3296_v50, %v2906_v44  ;;  %v1665_v44 = vrot.slane %v657_v16, %v3639_v6 }
 0x1e7   :  { %v3298_v60 = vadd.f32 %v3297_v54, %v2907_v49  ;;  %v2919_v49 = vmul.f32 %v1661_v40, %v469_v39  ;;  %v481_v39 = vunpack.c.h.bf16 %v162_v29  ;;  %v1709_v40 = vrot.slane %v658_v56, %v3648_v17  ;;  %v168_v29 = vld [vmem:[#allocation3 + $0x400] sm:$0xff] }
 0x1e9   :  { %v3299_v1 = vadd.f32 %v3298_v60, %v2908_v53  ;;  %v2920_v53 = vmul.f32 %v1665_v44, %v470_v43  ;;  %v482_v43 = vunpack.c.l.bf16 %v163_v38  ;;  %v1713_v44 = vrot.slane %v658_v56, %v3652_v24 }
 0x1eb   :  { %v3300_v9 = vadd.f32 %v3299_v1, %v2909_v59  ;;  %v2921_v59 = vmul.f32 %v1669_v48, %v471_v37  ;;  %v659_v37 = vld [vmem:[#allocation6 + $0xf8] sm:$0xff]  ;;  %v483_v48 = vunpack.c.h.bf16 %v163_v38 }
 0x1ed   :  { %v3301_v13 = vadd.f32 %v3300_v9, %v2910_v63  ;;  %v2922_v63 = vmul.f32 %v1673_v52, %v472_v51  ;;  %v2923_v9 = vmul.f32 %v1677_v58, %v473_v57  ;;  %v484_v52 = vunpack.c.l.bf16 %v164_v47  ;;  %v165_v57 = vld [vmem:[#allocation3 + $0x3e8] sm:$0xff] }
 0x1ee   :  { %v485_v58 = vunpack.c.h.bf16 %v164_v47 }
 0x1ef   :  { %v3302_v21 = vadd.f32 %v3301_v13, %v2911_v7  ;;  %v1685_v7 = vrot.slane %v657_v16, %v3654_v27  ;;  %v2924_v13 = vmul.f32 %v1681_v62, %v474_v61  ;;  %v479_v16 = vunpack.c.h.bf16 %v161_v18  ;;  %v167_v18 = vld [vmem:[#allocation3 + $0x3f8] sm:$0xff] }
 0x1f0   :  { %v486_v62 = vunpack.c.l.bf16 %v165_v57 }
 0x1f1   :  { %v3303_v26 = vadd.f32 %v3302_v21, %v2912_v12  ;;  %v1689_v12 = vrot.slane %v658_v56, %v3635_v2  ;;  %v2925_v21 = vmul.f32 %v1685_v7, %v475_v5  ;;  %v166_v5 = vld [vmem:[#allocation3 + $0x3f0] sm:$0xff]  ;;  %v1733_v7 = vrot.slane %v659_v37, %v3641_v8 }
 0x1f3   :  { %v3304_v32 = vadd.f32 %v3303_v26, %v2913_v20  ;;  %v1693_v20 = vrot.slane %v658_v56, %v3637_v3  ;;  %v2926_v26 = vmul.f32 %v1689_v12, %v476_v11  ;;  %v488_v11 = vunpack.c.l.bf16 %v166_v5 }
 0x1f4   :  { %v1737_v12 = vrot.slane %v659_v37, %v3646_v15 }
 0x1f5   :  { %v3305_v36 = vadd.f32 %v3304_v32, %v2914_v25  ;;  %v1697_v25 = vrot.slane %v658_v56, %v3639_v6 }
 0x1f7   :  { %v3306_v42 = vadd.f32 %v3305_v36, %v2915_v31  ;;  %v2927_v31 = vmul.f32 %v1693_v20, %v477_v19  ;;  %v489_v19 = vunpack.c.h.bf16 %v166_v5  ;;  %v1741_v20 = vrot.slane %v659_v37, %v3648_v17  ;;  %v172_v5 = vld [vmem:[#allocation3 + $0x420] sm:$0xff] }
 0x1f9   :  { %v3307_v46 = vadd.f32 %v3306_v42, %v2916_v35  ;;  %v2928_v35 = vmul.f32 %v1697_v25, %v478_v23  ;;  %v490_v23 = vunpack.c.l.bf16 %v167_v18  ;;  %v1745_v25 = vrot.slane %v659_v37, %v3652_v24 }
 0x1fb   :  { %v3308_v50 = vadd.f32 %v3307_v46, %v2917_v41  ;;  %v2929_v41 = vmul.f32 %v1701_v30, %v479_v16  ;;  %v660_v16 = vld [vmem:[#allocation6 + $0x100] sm:$0xff]  ;;  %v491_v30 = vunpack.c.h.bf16 %v167_v18 }
 0x1fd   :  { %v3309_v54 = vadd.f32 %v3308_v50, %v2918_v45  ;;  %v2930_v45 = vmul.f32 %v1705_v34, %v480_v33  ;;  %v2931_v50 = vmul.f32 %v1709_v40, %v481_v39  ;;  %v492_v34 = vunpack.c.l.bf16 %v168_v29  ;;  %v169_v39 = vld [vmem:[#allocation3 + $0x408] sm:$0xff] }
 0x1fe   :  { %v493_v40 = vunpack.c.h.bf16 %v168_v29 }
 0x1ff   :  { %v3310_v60 = vadd.f32 %v3309_v54, %v2919_v49  ;;  %v1717_v49 = vrot.slane %v658_v56, %v3654_v27  ;;  %v2932_v54 = vmul.f32 %v1713_v44, %v482_v43  ;;  %v487_v56 = vunpack.c.h.bf16 %v165_v57  ;;  %v171_v57 = vld [vmem:[#allocation3 + $0x418] sm:$0xff] }
 0x200   :  { %v494_v44 = vunpack.c.l.bf16 %v169_v39 }
 0x201   :  { %v3311_v1 = vadd.f32 %v3310_v60, %v2920_v53  ;;  %v1721_v53 = vrot.slane %v659_v37, %v3635_v2  ;;  %v2933_v60 = vmul.f32 %v1717_v49, %v483_v48  ;;  %v170_v48 = vld [vmem:[#allocation3 + $0x410] sm:$0xff]  ;;  %v1765_v49 = vrot.slane %v660_v16, %v3641_v8 }
 0x203   :  { %v3312_v10 = vadd.f32 %v3311_v1, %v2921_v59  ;;  %v1725_v59 = vrot.slane %v659_v37, %v3637_v3  ;;  %v2934_v1 = vmul.f32 %v1721_v53, %v484_v52  ;;  %v496_v52 = vunpack.c.l.bf16 %v170_v48 }
 0x204   :  { %v1769_v53 = vrot.slane %v660_v16, %v3646_v15 }
 0x205   :  { %v3313_v14 = vadd.f32 %v3312_v10, %v2922_v63  ;;  %v1729_v63 = vrot.slane %v659_v37, %v3639_v6 }
 0x207   :  { %v3314_v22 = vadd.f32 %v3313_v14, %v2923_v9  ;;  %v2935_v9 = vmul.f32 %v1725_v59, %v485_v58  ;;  %v497_v58 = vunpack.c.h.bf16 %v170_v48  ;;  %v1773_v59 = vrot.slane %v660_v16, %v3648_v17  ;;  %v176_v48 = vld [vmem:[#allocation3 + $0x440] sm:$0xff] }
 0x209   :  { %v3315_v28 = vadd.f32 %v3314_v22, %v2924_v13  ;;  %v2936_v13 = vmul.f32 %v1729_v63, %v486_v62  ;;  %v498_v62 = vunpack.c.l.bf16 %v171_v57  ;;  %v1777_v63 = vrot.slane %v660_v16, %v3652_v24 }
 0x20b   :  { %v3316_v32 = vadd.f32 %v3315_v28, %v2925_v21  ;;  %v2937_v21 = vmul.f32 %v1733_v7, %v487_v56  ;;  %v661_v56 = vld [vmem:[#allocation6 + $0x108] sm:$0xff]  ;;  %v499_v7 = vunpack.c.h.bf16 %v171_v57 }
 0x20d   :  { %v3317_v36 = vadd.f32 %v3316_v32, %v2926_v26  ;;  %v2938_v26 = vmul.f32 %v1737_v12, %v488_v11  ;;  %v2939_v32 = vmul.f32 %v1741_v20, %v489_v19  ;;  %v500_v12 = vunpack.c.l.bf16 %v172_v5  ;;  %v173_v19 = vld [vmem:[#allocation3 + $0x428] sm:$0xff] }
 0x20e   :  { %v501_v20 = vunpack.c.h.bf16 %v172_v5 }
 0x20f   :  { %v3318_v42 = vadd.f32 %v3317_v36, %v2927_v31  ;;  %v1749_v31 = vrot.slane %v659_v37, %v3654_v27  ;;  %v2940_v36 = vmul.f32 %v1745_v25, %v490_v23  ;;  %v495_v37 = vunpack.c.h.bf16 %v169_v39  ;;  %v175_v39 = vld [vmem:[#allocation3 + $0x438] sm:$0xff] }
 0x210   :  { %v502_v25 = vunpack.c.l.bf16 %v173_v19 }
 0x211   :  { %v3319_v46 = vadd.f32 %v3318_v42, %v2928_v35  ;;  %v1753_v35 = vrot.slane %v660_v16, %v3635_v2  ;;  %v2941_v42 = vmul.f32 %v1749_v31, %v491_v30  ;;  %v174_v30 = vld [vmem:[#allocation3 + $0x430] sm:$0xff]  ;;  %v1797_v31 = vrot.slane %v661_v56, %v3641_v8 }
 0x213   :  { %v3320_v51 = vadd.f32 %v3319_v46, %v2929_v41  ;;  %v1757_v41 = vrot.slane %v660_v16, %v3637_v3  ;;  %v2942_v46 = vmul.f32 %v1753_v35, %v492_v34  ;;  %v504_v34 = vunpack.c.l.bf16 %v174_v30 }
 0x214   :  { %v1801_v35 = vrot.slane %v661_v56, %v3646_v15 }
 0x215   :  { %v3321_v55 = vadd.f32 %v3320_v51, %v2930_v45  ;;  %v1761_v45 = vrot.slane %v660_v16, %v3639_v6 }
 0x217   :  { %v3322_v61 = vadd.f32 %v3321_v55, %v2931_v50  ;;  %v2943_v50 = vmul.f32 %v1757_v41, %v493_v40  ;;  %v505_v40 = vunpack.c.h.bf16 %v174_v30  ;;  %v1805_v41 = vrot.slane %v661_v56, %v3648_v17  ;;  %v180_v30 = vld [vmem:[#allocation3 + $0x460] sm:$0xff] }
 0x219   :  { %v3323_v4 = vadd.f32 %v3322_v61, %v2932_v54  ;;  %v2944_v54 = vmul.f32 %v1761_v45, %v494_v44  ;;  %v506_v44 = vunpack.c.l.bf16 %v175_v39  ;;  %v1809_v45 = vrot.slane %v661_v56, %v3652_v24 }
 0x21b   :  { %v3324_v10 = vadd.f32 %v3323_v4, %v2933_v60  ;;  %v2945_v60 = vmul.f32 %v1765_v49, %v495_v37  ;;  %v662_v37 = vld [vmem:[#allocation6 + $0x110] sm:$0xff]  ;;  %v507_v49 = vunpack.c.h.bf16 %v175_v39 }
 0x21d   :  { %v3325_v14 = vadd.f32 %v3324_v10, %v2934_v1  ;;  %v2946_v1 = vmul.f32 %v1769_v53, %v496_v52  ;;  %v2947_v10 = vmul.f32 %v1773_v59, %v497_v58  ;;  %v508_v53 = vunpack.c.l.bf16 %v176_v48  ;;  %v177_v58 = vld [vmem:[#allocation3 + $0x448] sm:$0xff] }
 0x21e   :  { %v509_v59 = vunpack.c.h.bf16 %v176_v48 }
 0x21f   :  { %v3326_v22 = vadd.f32 %v3325_v14, %v2935_v9  ;;  %v1781_v9 = vrot.slane %v660_v16, %v3654_v27  ;;  %v2948_v14 = vmul.f32 %v1777_v63, %v498_v62  ;;  %v503_v16 = vunpack.c.h.bf16 %v173_v19  ;;  %v179_v19 = vld [vmem:[#allocation3 + $0x458] sm:$0xff] }
 0x220   :  { %v510_v63 = vunpack.c.l.bf16 %v177_v58 }
 0x221   :  { %v3327_v28 = vadd.f32 %v3326_v22, %v2936_v13  ;;  %v1785_v13 = vrot.slane %v661_v56, %v3635_v2  ;;  %v2949_v22 = vmul.f32 %v1781_v9, %v499_v7  ;;  %v178_v7 = vld [vmem:[#allocation3 + $0x450] sm:$0xff]  ;;  %v1829_v9 = vrot.slane %v662_v37, %v3641_v8 }
 0x223   :  { %v3328_v33 = vadd.f32 %v3327_v28, %v2937_v21  ;;  %v1789_v21 = vrot.slane %v661_v56, %v3637_v3  ;;  %v2950_v28 = vmul.f32 %v1785_v13, %v500_v12  ;;  %v512_v12 = vunpack.c.l.bf16 %v178_v7 }
 0x224   :  { %v1833_v13 = vrot.slane %v662_v37, %v3646_v15 }
 0x225   :  { %v3329_v38 = vadd.f32 %v3328_v33, %v2938_v26  ;;  %v1793_v26 = vrot.slane %v661_v56, %v3639_v6 }
 0x227   :  { %v3330_v43 = vadd.f32 %v3329_v38, %v2939_v32  ;;  %v2951_v32 = vmul.f32 %v1789_v21, %v501_v20  ;;  %v513_v20 = vunpack.c.h.bf16 %v178_v7  ;;  %v1837_v21 = vrot.slane %v662_v37, %v3648_v17  ;;  %v184_v7 = vld [vmem:[#allocation3 + $0x480] sm:$0xff] }
 0x229   :  { %v3331_v47 = vadd.f32 %v3330_v43, %v2940_v36  ;;  %v2952_v36 = vmul.f32 %v1793_v26, %v502_v25  ;;  %v514_v25 = vunpack.c.l.bf16 %v179_v19  ;;  %v1841_v26 = vrot.slane %v662_v37, %v3652_v24 }
 0x22b   :  { %v3332_v51 = vadd.f32 %v3331_v47, %v2941_v42  ;;  %v2953_v42 = vmul.f32 %v1797_v31, %v503_v16  ;;  %v663_v16 = vld [vmem:[#allocation6 + $0x118] sm:$0xff]  ;;  %v515_v31 = vunpack.c.h.bf16 %v179_v19 }
 0x22d   :  { %v3333_v55 = vadd.f32 %v3332_v51, %v2942_v46  ;;  %v2954_v46 = vmul.f32 %v1801_v35, %v504_v34  ;;  %v2955_v51 = vmul.f32 %v1805_v41, %v505_v40  ;;  %v516_v35 = vunpack.c.l.bf16 %v180_v30  ;;  %v181_v40 = vld [vmem:[#allocation3 + $0x468] sm:$0xff] }
 0x22e   :  { %v517_v41 = vunpack.c.h.bf16 %v180_v30 }
 0x22f   :  { %v3334_v61 = vadd.f32 %v3333_v55, %v2943_v50  ;;  %v1813_v50 = vrot.slane %v661_v56, %v3654_v27  ;;  %v2956_v55 = vmul.f32 %v1809_v45, %v506_v44  ;;  %v511_v56 = vunpack.c.h.bf16 %v177_v58  ;;  %v183_v58 = vld [vmem:[#allocation3 + $0x478] sm:$0xff] }
 0x230   :  { %v518_v45 = vunpack.c.l.bf16 %v181_v40 }
 0x231   :  { %v3335_v4 = vadd.f32 %v3334_v61, %v2944_v54  ;;  %v1817_v54 = vrot.slane %v662_v37, %v3635_v2  ;;  %v2957_v61 = vmul.f32 %v1813_v50, %v507_v49  ;;  %v182_v49 = vld [vmem:[#allocation3 + $0x470] sm:$0xff]  ;;  %v1861_v50 = vrot.slane %v663_v16, %v3641_v8 }
 0x233   :  { %v3336_v11 = vadd.f32 %v3335_v4, %v2945_v60  ;;  %v1821_v60 = vrot.slane %v662_v37, %v3637_v3  ;;  %v2958_v4 = vmul.f32 %v1817_v54, %v508_v53  ;;  %v520_v53 = vunpack.c.l.bf16 %v182_v49 }
 0x234   :  { %v1865_v54 = vrot.slane %v663_v16, %v3646_v15 }
 0x235   :  { %v3337_v18 = vadd.f32 %v3336_v11, %v2946_v1  ;;  %v1825_v1 = vrot.slane %v662_v37, %v3639_v6 }
 0x237   :  { %v3338_v23 = vadd.f32 %v3337_v18, %v2947_v10  ;;  %v2959_v10 = vmul.f32 %v1821_v60, %v509_v59  ;;  %v521_v59 = vunpack.c.h.bf16 %v182_v49  ;;  %v1869_v60 = vrot.slane %v663_v16, %v3648_v17  ;;  %v188_v49 = vld [vmem:[#allocation3 + $0x4a0] sm:$0xff] }
 0x239   :  { %v3339_v29 = vadd.f32 %v3338_v23, %v2948_v14  ;;  %v2960_v14 = vmul.f32 %v1825_v1, %v510_v63  ;;  %v522_v63 = vunpack.c.l.bf16 %v183_v58  ;;  %v1873_v1 = vrot.slane %v663_v16, %v3652_v24 }
 0x23b   :  { %v3340_v33 = vadd.f32 %v3339_v29, %v2949_v22  ;;  %v2961_v22 = vmul.f32 %v1829_v9, %v511_v56  ;;  %v664_v56 = vld [vmem:[#allocation6 + $0x120] sm:$0xff]  ;;  %v523_v9 = vunpack.c.h.bf16 %v183_v58 }
 0x23d   :  { %v3341_v38 = vadd.f32 %v3340_v33, %v2950_v28  ;;  %v2962_v28 = vmul.f32 %v1833_v13, %v512_v12  ;;  %v2963_v33 = vmul.f32 %v1837_v21, %v513_v20  ;;  %v524_v13 = vunpack.c.l.bf16 %v184_v7  ;;  %v185_v20 = vld [vmem:[#allocation3 + $0x488] sm:$0xff] }
 0x23e   :  { %v525_v21 = vunpack.c.h.bf16 %v184_v7 }
 0x23f   :  { %v3342_v43 = vadd.f32 %v3341_v38, %v2951_v32  ;;  %v1845_v32 = vrot.slane %v662_v37, %v3654_v27  ;;  %v2964_v38 = vmul.f32 %v1841_v26, %v514_v25  ;;  %v519_v37 = vunpack.c.h.bf16 %v181_v40  ;;  %v187_v40 = vld [vmem:[#allocation3 + $0x498] sm:$0xff] }
 0x240   :  { %v526_v26 = vunpack.c.l.bf16 %v185_v20 }
 0x241   :  { %v3343_v47 = vadd.f32 %v3342_v43, %v2952_v36  ;;  %v1849_v36 = vrot.slane %v663_v16, %v3635_v2  ;;  %v2965_v43 = vmul.f32 %v1845_v32, %v515_v31  ;;  %v186_v31 = vld [vmem:[#allocation3 + $0x490] sm:$0xff]  ;;  %v1893_v32 = vrot.slane %v664_v56, %v3641_v8 }
 0x243   :  { %v3344_v52 = vadd.f32 %v3343_v47, %v2953_v42  ;;  %v1853_v42 = vrot.slane %v663_v16, %v3637_v3  ;;  %v2966_v47 = vmul.f32 %v1849_v36, %v516_v35  ;;  %v528_v35 = vunpack.c.l.bf16 %v186_v31 }
 0x244   :  { %v1897_v36 = vrot.slane %v664_v56, %v3646_v15 }
 0x245   :  { %v3345_v57 = vadd.f32 %v3344_v52, %v2954_v46  ;;  %v1857_v46 = vrot.slane %v663_v16, %v3639_v6 }
 0x247   :  { %v3346_v62 = vadd.f32 %v3345_v57, %v2955_v51  ;;  %v2967_v51 = vmul.f32 %v1853_v42, %v517_v41  ;;  %v529_v41 = vunpack.c.h.bf16 %v186_v31  ;;  %v1901_v42 = vrot.slane %v664_v56, %v3648_v17  ;;  %v192_v31 = vld [vmem:[#allocation3 + $0x4c0] sm:$0xff] }
 0x249   :  { %v3347_v5 = vadd.f32 %v3346_v62, %v2956_v55  ;;  %v2968_v55 = vmul.f32 %v1857_v46, %v518_v45  ;;  %v530_v45 = vunpack.c.l.bf16 %v187_v40  ;;  %v1905_v46 = vrot.slane %v664_v56, %v3652_v24 }
 0x24b   :  { %v3348_v11 = vadd.f32 %v3347_v5, %v2957_v61  ;;  %v2969_v61 = vmul.f32 %v1861_v50, %v519_v37  ;;  %v665_v37 = vld [vmem:[#allocation6 + $0x128] sm:$0xff]  ;;  %v531_v50 = vunpack.c.h.bf16 %v187_v40 }
 0x24d   :  { %v3349_v18 = vadd.f32 %v3348_v11, %v2958_v4  ;;  %v2970_v4 = vmul.f32 %v1865_v54, %v520_v53  ;;  %v2971_v11 = vmul.f32 %v1869_v60, %v521_v59  ;;  %v532_v54 = vunpack.c.l.bf16 %v188_v49  ;;  %v189_v59 = vld [vmem:[#allocation3 + $0x4a8] sm:$0xff] }
 0x24e   :  { %v533_v60 = vunpack.c.h.bf16 %v188_v49 }
 0x24f   :  { %v3350_v23 = vadd.f32 %v3349_v18, %v2959_v10  ;;  %v1877_v10 = vrot.slane %v663_v16, %v3654_v27  ;;  %v2972_v18 = vmul.f32 %v1873_v1, %v522_v63  ;;  %v527_v16 = vunpack.c.h.bf16 %v185_v20  ;;  %v191_v20 = vld [vmem:[#allocation3 + $0x4b8] sm:$0xff] }
 0x250   :  { %v534_v1 = vunpack.c.l.bf16 %v189_v59 }
 0x251   :  { %v3351_v29 = vadd.f32 %v3350_v23, %v2960_v14  ;;  %v1881_v14 = vrot.slane %v664_v56, %v3635_v2  ;;  %v2973_v23 = vmul.f32 %v1877_v10, %v523_v9  ;;  %v190_v9 = vld [vmem:[#allocation3 + $0x4b0] sm:$0xff]  ;;  %v1925_v10 = vrot.slane %v665_v37, %v3641_v8 }
 0x253   :  { %v3352_v34 = vadd.f32 %v3351_v29, %v2961_v22  ;;  %v1885_v22 = vrot.slane %v664_v56, %v3637_v3  ;;  %v2974_v29 = vmul.f32 %v1881_v14, %v524_v13  ;;  %v536_v13 = vunpack.c.l.bf16 %v190_v9 }
 0x254   :  { %v1929_v14 = vrot.slane %v665_v37, %v3646_v15 }
 0x255   :  { %v3353_v39 = vadd.f32 %v3352_v34, %v2962_v28  ;;  %v1889_v28 = vrot.slane %v664_v56, %v3639_v6 }
 0x257   :  { %v3354_v44 = vadd.f32 %v3353_v39, %v2963_v33  ;;  %v2975_v33 = vmul.f32 %v1885_v22, %v525_v21  ;;  %v537_v21 = vunpack.c.h.bf16 %v190_v9  ;;  %v1933_v22 = vrot.slane %v665_v37, %v3648_v17  ;;  %v196_v9 = vld [vmem:[#allocation3 + $0x4e0] sm:$0xff] }
 0x259   :  { %v3355_v48 = vadd.f32 %v3354_v44, %v2964_v38  ;;  %v2976_v38 = vmul.f32 %v1889_v28, %v526_v26  ;;  %v538_v26 = vunpack.c.l.bf16 %v191_v20  ;;  %v1937_v28 = vrot.slane %v665_v37, %v3652_v24 }
 0x25b   :  { %v3356_v52 = vadd.f32 %v3355_v48, %v2965_v43  ;;  %v2977_v43 = vmul.f32 %v1893_v32, %v527_v16  ;;  %v666_v16 = vld [vmem:[#allocation6 + $0x130] sm:$0xff]  ;;  %v539_v32 = vunpack.c.h.bf16 %v191_v20 }
 0x25d   :  { %v3357_v57 = vadd.f32 %v3356_v52, %v2966_v47  ;;  %v2978_v47 = vmul.f32 %v1897_v36, %v528_v35  ;;  %v2979_v52 = vmul.f32 %v1901_v42, %v529_v41  ;;  %v540_v36 = vunpack.c.l.bf16 %v192_v31  ;;  %v193_v41 = vld [vmem:[#allocation3 + $0x4c8] sm:$0xff] }
 0x25e   :  { %v541_v42 = vunpack.c.h.bf16 %v192_v31 }
 0x25f   :  { %v3358_v62 = vadd.f32 %v3357_v57, %v2967_v51  ;;  %v1909_v51 = vrot.slane %v664_v56, %v3654_v27  ;;  %v2980_v57 = vmul.f32 %v1905_v46, %v530_v45  ;;  %v535_v56 = vunpack.c.h.bf16 %v189_v59  ;;  %v195_v59 = vld [vmem:[#allocation3 + $0x4d8] sm:$0xff] }
 0x260   :  { %v542_v46 = vunpack.c.l.bf16 %v193_v41 }
 0x261   :  { %v3359_v5 = vadd.f32 %v3358_v62, %v2968_v55  ;;  %v1913_v55 = vrot.slane %v665_v37, %v3635_v2  ;;  %v2981_v62 = vmul.f32 %v1909_v51, %v531_v50  ;;  %v194_v50 = vld [vmem:[#allocation3 + $0x4d0] sm:$0xff]  ;;  %v1957_v51 = vrot.slane %v666_v16, %v3641_v8 }
 0x263   :  { %v3360_v12 = vadd.f32 %v3359_v5, %v2969_v61  ;;  %v1917_v61 = vrot.slane %v665_v37, %v3637_v3  ;;  %v2982_v5 = vmul.f32 %v1913_v55, %v532_v54  ;;  %v544_v54 = vunpack.c.l.bf16 %v194_v50 }
 0x264   :  { %v1961_v55 = vrot.slane %v666_v16, %v3646_v15 }
 0x265   :  { %v3361_v19 = vadd.f32 %v3360_v12, %v2970_v4  ;;  %v1921_v4 = vrot.slane %v665_v37, %v3639_v6 }
 0x267   :  { %v3362_v25 = vadd.f32 %v3361_v19, %v2971_v11  ;;  %v2983_v11 = vmul.f32 %v1917_v61, %v533_v60  ;;  %v545_v60 = vunpack.c.h.bf16 %v194_v50  ;;  %v1965_v61 = vrot.slane %v666_v16, %v3648_v17  ;;  %v200_v50 = vld [vmem:[#allocation3 + $0x500] sm:$0xff] }
 0x269   :  { %v3363_v30 = vadd.f32 %v3362_v25, %v2972_v18  ;;  %v2984_v18 = vmul.f32 %v1921_v4, %v534_v1  ;;  %v546_v1 = vunpack.c.l.bf16 %v195_v59  ;;  %v1969_v4 = vrot.slane %v666_v16, %v3652_v24 }
 0x26b   :  { %v3364_v34 = vadd.f32 %v3363_v30, %v2973_v23  ;;  %v2985_v23 = vmul.f32 %v1925_v10, %v535_v56  ;;  %v667_v56 = vld [vmem:[#allocation6 + $0x138] sm:$0xff]  ;;  %v547_v10 = vunpack.c.h.bf16 %v195_v59 }
 0x26d   :  { %v3365_v39 = vadd.f32 %v3364_v34, %v2974_v29  ;;  %v2986_v29 = vmul.f32 %v1929_v14, %v536_v13  ;;  %v2987_v34 = vmul.f32 %v1933_v22, %v537_v21  ;;  %v548_v14 = vunpack.c.l.bf16 %v196_v9  ;;  %v197_v21 = vld [vmem:[#allocation3 + $0x4e8] sm:$0xff] }
 0x26e   :  { %v549_v22 = vunpack.c.h.bf16 %v196_v9 }
 0x26f   :  { %v3366_v44 = vadd.f32 %v3365_v39, %v2975_v33  ;;  %v1941_v33 = vrot.slane %v665_v37, %v3654_v27  ;;  %v2988_v39 = vmul.f32 %v1937_v28, %v538_v26  ;;  %v543_v37 = vunpack.c.h.bf16 %v193_v41  ;;  %v199_v41 = vld [vmem:[#allocation3 + $0x4f8] sm:$0xff] }
 0x270   :  { %v550_v28 = vunpack.c.l.bf16 %v197_v21 }
 0x271   :  { %v3367_v48 = vadd.f32 %v3366_v44, %v2976_v38  ;;  %v1945_v38 = vrot.slane %v666_v16, %v3635_v2  ;;  %v2989_v44 = vmul.f32 %v1941_v33, %v539_v32  ;;  %v198_v32 = vld [vmem:[#allocation3 + $0x4f0] sm:$0xff]  ;;  %v1989_v33 = vrot.slane %v667_v56, %v3641_v8 }
 0x273   :  { %v3368_v53 = vadd.f32 %v3367_v48, %v2977_v43  ;;  %v1949_v43 = vrot.slane %v666_v16, %v3637_v3  ;;  %v2990_v48 = vmul.f32 %v1945_v38, %v540_v36  ;;  %v552_v36 = vunpack.c.l.bf16 %v198_v32 }
 0x274   :  { %v1993_v38 = vrot.slane %v667_v56, %v3646_v15 }
 0x275   :  { %v3369_v58 = vadd.f32 %v3368_v53, %v2978_v47  ;;  %v1953_v47 = vrot.slane %v666_v16, %v3639_v6 }
 0x277   :  { %v3370_v63 = vadd.f32 %v3369_v58, %v2979_v52  ;;  %v2991_v52 = vmul.f32 %v1949_v43, %v541_v42  ;;  %v553_v42 = vunpack.c.h.bf16 %v198_v32  ;;  %v1997_v43 = vrot.slane %v667_v56, %v3648_v17  ;;  %v204_v32 = vld [vmem:[#allocation3 + $0x520] sm:$0xff] }
 0x279   :  { %v3371_v7 = vadd.f32 %v3370_v63, %v2980_v57  ;;  %v2992_v57 = vmul.f32 %v1953_v47, %v542_v46  ;;  %v554_v46 = vunpack.c.l.bf16 %v199_v41  ;;  %v2001_v47 = vrot.slane %v667_v56, %v3652_v24 }
 0x27b   :  { %v3372_v12 = vadd.f32 %v3371_v7, %v2981_v62  ;;  %v2993_v62 = vmul.f32 %v1957_v51, %v543_v37  ;;  %v668_v37 = vld [vmem:[#allocation6 + $0x140] sm:$0xff]  ;;  %v555_v51 = vunpack.c.h.bf16 %v199_v41 }
 0x27d   :  { %v3373_v19 = vadd.f32 %v3372_v12, %v2982_v5  ;;  %v2994_v5 = vmul.f32 %v1961_v55, %v544_v54  ;;  %v2995_v12 = vmul.f32 %v1965_v61, %v545_v60  ;;  %v556_v55 = vunpack.c.l.bf16 %v200_v50  ;;  %v201_v60 = vld [vmem:[#allocation3 + $0x508] sm:$0xff] }
 0x27e   :  { %v557_v61 = vunpack.c.h.bf16 %v200_v50 }
 0x27f   :  { %v3374_v25 = vadd.f32 %v3373_v19, %v2983_v11  ;;  %v1973_v11 = vrot.slane %v666_v16, %v3654_v27  ;;  %v2996_v19 = vmul.f32 %v1969_v4, %v546_v1  ;;  %v551_v16 = vunpack.c.h.bf16 %v197_v21  ;;  %v203_v21 = vld [vmem:[#allocation3 + $0x518] sm:$0xff] }
 0x280   :  { %v558_v4 = vunpack.c.l.bf16 %v201_v60 }
 0x281   :  { %v3375_v30 = vadd.f32 %v3374_v25, %v2984_v18  ;;  %v1977_v18 = vrot.slane %v667_v56, %v3635_v2  ;;  %v2997_v25 = vmul.f32 %v1973_v11, %v547_v10  ;;  %v202_v10 = vld [vmem:[#allocation3 + $0x510] sm:$0xff]  ;;  %v2021_v11 = vrot.slane %v668_v37, %v3641_v8 }
 0x283   :  { %v3376_v35 = vadd.f32 %v3375_v30, %v2985_v23  ;;  %v1981_v23 = vrot.slane %v667_v56, %v3637_v3  ;;  %v2998_v30 = vmul.f32 %v1977_v18, %v548_v14  ;;  %v560_v14 = vunpack.c.l.bf16 %v202_v10 }
 0x284   :  { %v2025_v18 = vrot.slane %v668_v37, %v3646_v15 }
 0x285   :  { %v3377_v40 = vadd.f32 %v3376_v35, %v2986_v29  ;;  %v1985_v29 = vrot.slane %v667_v56, %v3639_v6 }
 0x287   :  { %v3378_v45 = vadd.f32 %v3377_v40, %v2987_v34  ;;  %v2999_v34 = vmul.f32 %v1981_v23, %v549_v22  ;;  %v561_v22 = vunpack.c.h.bf16 %v202_v10  ;;  %v2029_v23 = vrot.slane %v668_v37, %v3648_v17  ;;  %v208_v10 = vld [vmem:[#allocation3 + $0x540] sm:$0xff] }
 0x289   :  { %v3379_v49 = vadd.f32 %v3378_v45, %v2988_v39  ;;  %v3000_v39 = vmul.f32 %v1985_v29, %v550_v28  ;;  %v562_v28 = vunpack.c.l.bf16 %v203_v21  ;;  %v2033_v29 = vrot.slane %v668_v37, %v3652_v24 }
 0x28b   :  { %v3380_v53 = vadd.f32 %v3379_v49, %v2989_v44  ;;  %v3001_v44 = vmul.f32 %v1989_v33, %v551_v16  ;;  %v669_v16 = vld [vmem:[#allocation6 + $0x148] sm:$0xff]  ;;  %v563_v33 = vunpack.c.h.bf16 %v203_v21 }
 0x28d   :  { %v3381_v58 = vadd.f32 %v3380_v53, %v2990_v48  ;;  %v3002_v48 = vmul.f32 %v1993_v38, %v552_v36  ;;  %v3003_v53 = vmul.f32 %v1997_v43, %v553_v42  ;;  %v564_v38 = vunpack.c.l.bf16 %v204_v32  ;;  %v205_v42 = vld [vmem:[#allocation3 + $0x528] sm:$0xff] }
 0x28e   :  { %v565_v43 = vunpack.c.h.bf16 %v204_v32 }
 0x28f   :  { %v3382_v63 = vadd.f32 %v3381_v58, %v2991_v52  ;;  %v2005_v52 = vrot.slane %v667_v56, %v3654_v27  ;;  %v3004_v58 = vmul.f32 %v2001_v47, %v554_v46  ;;  %v559_v56 = vunpack.c.h.bf16 %v201_v60  ;;  %v207_v60 = vld [vmem:[#allocation3 + $0x538] sm:$0xff] }
 0x290   :  { %v566_v47 = vunpack.c.l.bf16 %v205_v42 }
 0x291   :  { %v3383_v7 = vadd.f32 %v3382_v63, %v2992_v57  ;;  %v2009_v57 = vrot.slane %v668_v37, %v3635_v2  ;;  %v3005_v63 = vmul.f32 %v2005_v52, %v555_v51  ;;  %v206_v51 = vld [vmem:[#allocation3 + $0x530] sm:$0xff]  ;;  %v2053_v52 = vrot.slane %v669_v16, %v3641_v8 }
 0x293   :  { %v3384_v13 = vadd.f32 %v3383_v7, %v2993_v62  ;;  %v2013_v62 = vrot.slane %v668_v37, %v3637_v3  ;;  %v3006_v7 = vmul.f32 %v2009_v57, %v556_v55  ;;  %v568_v55 = vunpack.c.l.bf16 %v206_v51 }
 0x294   :  { %v2057_v57 = vrot.slane %v669_v16, %v3646_v15 }
 0x295   :  { %v3385_v20 = vadd.f32 %v3384_v13, %v2994_v5  ;;  %v2017_v5 = vrot.slane %v668_v37, %v3639_v6 }
 0x297   :  { %v3386_v26 = vadd.f32 %v3385_v20, %v2995_v12  ;;  %v3007_v12 = vmul.f32 %v2013_v62, %v557_v61  ;;  %v569_v61 = vunpack.c.h.bf16 %v206_v51  ;;  %v2061_v62 = vrot.slane %v669_v16, %v3648_v17  ;;  %v212_v51 = vld [vmem:[#allocation3 + $0x560] sm:$0xff] }
 0x299   :  { %v3387_v31 = vadd.f32 %v3386_v26, %v2996_v19  ;;  %v3008_v19 = vmul.f32 %v2017_v5, %v558_v4  ;;  %v570_v4 = vunpack.c.l.bf16 %v207_v60  ;;  %v2065_v5 = vrot.slane %v669_v16, %v3652_v24 }
 0x29b   :  { %v3388_v35 = vadd.f32 %v3387_v31, %v2997_v25  ;;  %v3009_v25 = vmul.f32 %v2021_v11, %v559_v56  ;;  %v670_v56 = vld [vmem:[#allocation6 + $0x150] sm:$0xff]  ;;  %v571_v11 = vunpack.c.h.bf16 %v207_v60 }
 0x29d   :  { %v3389_v40 = vadd.f32 %v3388_v35, %v2998_v30  ;;  %v3010_v30 = vmul.f32 %v2025_v18, %v560_v14  ;;  %v3011_v35 = vmul.f32 %v2029_v23, %v561_v22  ;;  %v572_v18 = vunpack.c.l.bf16 %v208_v10  ;;  %v209_v22 = vld [vmem:[#allocation3 + $0x548] sm:$0xff] }
 0x29e   :  { %v573_v23 = vunpack.c.h.bf16 %v208_v10 }
 0x29f   :  { %v3390_v45 = vadd.f32 %v3389_v40, %v2999_v34  ;;  %v2037_v34 = vrot.slane %v668_v37, %v3654_v27  ;;  %v3012_v40 = vmul.f32 %v2033_v29, %v562_v28  ;;  %v567_v37 = vunpack.c.h.bf16 %v205_v42  ;;  %v211_v42 = vld [vmem:[#allocation3 + $0x558] sm:$0xff] }
 0x2a0   :  { %v574_v29 = vunpack.c.l.bf16 %v209_v22 }
 0x2a1   :  { %v3391_v49 = vadd.f32 %v3390_v45, %v3000_v39  ;;  %v2041_v39 = vrot.slane %v669_v16, %v3635_v2  ;;  %v3013_v45 = vmul.f32 %v2037_v34, %v563_v33  ;;  %v210_v33 = vld [vmem:[#allocation3 + $0x550] sm:$0xff]  ;;  %v2085_v34 = vrot.slane %v670_v56, %v3641_v8 }
 0x2a3   :  { %v3392_v54 = vadd.f32 %v3391_v49, %v3001_v44  ;;  %v2045_v44 = vrot.slane %v669_v16, %v3637_v3  ;;  %v3014_v49 = vmul.f32 %v2041_v39, %v564_v38  ;;  %v576_v38 = vunpack.c.l.bf16 %v210_v33 }
 0x2a4   :  { %v2089_v39 = vrot.slane %v670_v56, %v3646_v15 }
 0x2a5   :  { %v3393_v59 = vadd.f32 %v3392_v54, %v3002_v48  ;;  %v2049_v48 = vrot.slane %v669_v16, %v3639_v6 }
 0x2a7   :  { %v3394_v1 = vadd.f32 %v3393_v59, %v3003_v53  ;;  %v3015_v53 = vmul.f32 %v2045_v44, %v565_v43  ;;  %v577_v43 = vunpack.c.h.bf16 %v210_v33  ;;  %v2093_v44 = vrot.slane %v670_v56, %v3648_v17  ;;  %v216_v33 = vld [vmem:[#allocation3 + $0x580] sm:$0xff] }
 0x2a9   :  { %v3395_v9 = vadd.f32 %v3394_v1, %v3004_v58  ;;  %v3016_v58 = vmul.f32 %v2049_v48, %v566_v47  ;;  %v578_v47 = vunpack.c.l.bf16 %v211_v42  ;;  %v2097_v48 = vrot.slane %v670_v56, %v3652_v24 }
 0x2ab   :  { %v3396_v13 = vadd.f32 %v3395_v9, %v3005_v63  ;;  %v3017_v63 = vmul.f32 %v2053_v52, %v567_v37  ;;  %v671_v37 = vld [vmem:[#allocation6 + $0x158] sm:$0xff]  ;;  %v579_v52 = vunpack.c.h.bf16 %v211_v42 }
 0x2ad   :  { %v3397_v20 = vadd.f32 %v3396_v13, %v3006_v7  ;;  %v3018_v7 = vmul.f32 %v2057_v57, %v568_v55  ;;  %v3019_v13 = vmul.f32 %v2061_v62, %v569_v61  ;;  %v580_v57 = vunpack.c.l.bf16 %v212_v51  ;;  %v213_v61 = vld [vmem:[#allocation3 + $0x568] sm:$0xff] }
 0x2ae   :  { %v581_v62 = vunpack.c.h.bf16 %v212_v51 }
 0x2af   :  { %v3398_v26 = vadd.f32 %v3397_v20, %v3007_v12  ;;  %v2069_v12 = vrot.slane %v669_v16, %v3654_v27  ;;  %v3020_v20 = vmul.f32 %v2065_v5, %v570_v4  ;;  %v575_v16 = vunpack.c.h.bf16 %v209_v22  ;;  %v215_v22 = vld [vmem:[#allocation3 + $0x578] sm:$0xff] }
 0x2b0   :  { %v582_v5 = vunpack.c.l.bf16 %v213_v61 }
 0x2b1   :  { %v3399_v31 = vadd.f32 %v3398_v26, %v3008_v19  ;;  %v2073_v19 = vrot.slane %v670_v56, %v3635_v2  ;;  %v3021_v26 = vmul.f32 %v2069_v12, %v571_v11  ;;  %v214_v11 = vld [vmem:[#allocation3 + $0x570] sm:$0xff]  ;;  %v2117_v12 = vrot.slane %v671_v37, %v3641_v8 }
 0x2b3   :  { %v3400_v36 = vadd.f32 %v3399_v31, %v3009_v25  ;;  %v2077_v25 = vrot.slane %v670_v56, %v3637_v3  ;;  %v3022_v31 = vmul.f32 %v2073_v19, %v572_v18  ;;  %v584_v18 = vunpack.c.l.bf16 %v214_v11 }
 0x2b4   :  { %v2121_v19 = vrot.slane %v671_v37, %v3646_v15 }
 0x2b5   :  { %v3401_v41 = vadd.f32 %v3400_v36, %v3010_v30  ;;  %v2081_v30 = vrot.slane %v670_v56, %v3639_v6 }
 0x2b7   :  { %v3402_v46 = vadd.f32 %v3401_v41, %v3011_v35  ;;  %v3023_v35 = vmul.f32 %v2077_v25, %v573_v23  ;;  %v585_v23 = vunpack.c.h.bf16 %v214_v11  ;;  %v2125_v25 = vrot.slane %v671_v37, %v3648_v17  ;;  %v220_v11 = vld [vmem:[#allocation3 + $0x5a0] sm:$0xff] }
 0x2b9   :  { %v3403_v50 = vadd.f32 %v3402_v46, %v3012_v40  ;;  %v3024_v40 = vmul.f32 %v2081_v30, %v574_v29  ;;  %v586_v29 = vunpack.c.l.bf16 %v215_v22  ;;  %v2129_v30 = vrot.slane %v671_v37, %v3652_v24 }
 0x2bb   :  { %v3404_v54 = vadd.f32 %v3403_v50, %v3013_v45  ;;  %v3025_v45 = vmul.f32 %v2085_v34, %v575_v16  ;;  %v672_v16 = vld [vmem:[#allocation6 + $0x160] sm:$0xff]  ;;  %v587_v34 = vunpack.c.h.bf16 %v215_v22 }
 0x2bd   :  { %v3405_v59 = vadd.f32 %v3404_v54, %v3014_v49  ;;  %v3026_v49 = vmul.f32 %v2089_v39, %v576_v38  ;;  %v3027_v54 = vmul.f32 %v2093_v44, %v577_v43  ;;  %v588_v39 = vunpack.c.l.bf16 %v216_v33  ;;  %v217_v43 = vld [vmem:[#allocation3 + $0x588] sm:$0xff] }
 0x2be   :  { %v589_v44 = vunpack.c.h.bf16 %v216_v33 }
 0x2bf   :  { %v3406_v1 = vadd.f32 %v3405_v59, %v3015_v53  ;;  %v2101_v53 = vrot.slane %v670_v56, %v3654_v27  ;;  %v3028_v59 = vmul.f32 %v2097_v48, %v578_v47  ;;  %v583_v56 = vunpack.c.h.bf16 %v213_v61  ;;  %v219_v61 = vld [vmem:[#allocation3 + $0x598] sm:$0xff] }
 0x2c0   :  { %v590_v48 = vunpack.c.l.bf16 %v217_v43 }
 0x2c1   :  { %v3407_v9 = vadd.f32 %v3406_v1, %v3016_v58  ;;  %v2105_v58 = vrot.slane %v671_v37, %v3635_v2  ;;  %v3029_v1 = vmul.f32 %v2101_v53, %v579_v52  ;;  %v218_v52 = vld [vmem:[#allocation3 + $0x590] sm:$0xff]  ;;  %v2149_v53 = vrot.slane %v672_v16, %v3641_v8 }
 0x2c3   :  { %v3408_v14 = vadd.f32 %v3407_v9, %v3017_v63  ;;  %v2109_v63 = vrot.slane %v671_v37, %v3637_v3  ;;  %v3030_v9 = vmul.f32 %v2105_v58, %v580_v57  ;;  %v592_v57 = vunpack.c.l.bf16 %v218_v52 }
 0x2c4   :  { %v2153_v58 = vrot.slane %v672_v16, %v3646_v15 }
 0x2c5   :  { %v3409_v21 = vadd.f32 %v3408_v14, %v3018_v7  ;;  %v2113_v7 = vrot.slane %v671_v37, %v3639_v6 }
 0x2c7   :  { %v3410_v28 = vadd.f32 %v3409_v21, %v3019_v13  ;;  %v3031_v13 = vmul.f32 %v2109_v63, %v581_v62  ;;  %v593_v62 = vunpack.c.h.bf16 %v218_v52  ;;  %v2157_v63 = vrot.slane %v672_v16, %v3648_v17  ;;  %v224_v52 = vld [vmem:[#allocation3 + $0x5c0] sm:$0xff] }
 0x2c9   :  { %v3411_v32 = vadd.f32 %v3410_v28, %v3020_v20  ;;  %v3032_v20 = vmul.f32 %v2113_v7, %v582_v5  ;;  %v594_v5 = vunpack.c.l.bf16 %v219_v61  ;;  %v2161_v7 = vrot.slane %v672_v16, %v3652_v24 }
 0x2cb   :  { %v3412_v36 = vadd.f32 %v3411_v32, %v3021_v26  ;;  %v3033_v26 = vmul.f32 %v2117_v12, %v583_v56  ;;  %v673_v56 = vld [vmem:[#allocation6 + $0x168] sm:$0xff]  ;;  %v595_v12 = vunpack.c.h.bf16 %v219_v61 }
 0x2cd   :  { %v3413_v41 = vadd.f32 %v3412_v36, %v3022_v31  ;;  %v3034_v31 = vmul.f32 %v2121_v19, %v584_v18  ;;  %v3035_v36 = vmul.f32 %v2125_v25, %v585_v23  ;;  %v596_v19 = vunpack.c.l.bf16 %v220_v11  ;;  %v221_v23 = vld [vmem:[#allocation3 + $0x5a8] sm:$0xff] }
 0x2ce   :  { %v597_v25 = vunpack.c.h.bf16 %v220_v11 }
 0x2cf   :  { %v3414_v46 = vadd.f32 %v3413_v41, %v3023_v35  ;;  %v2133_v35 = vrot.slane %v671_v37, %v3654_v27  ;;  %v3036_v41 = vmul.f32 %v2129_v30, %v586_v29  ;;  %v591_v37 = vunpack.c.h.bf16 %v217_v43  ;;  %v223_v43 = vld [vmem:[#allocation3 + $0x5b8] sm:$0xff] }
 0x2d0   :  { %v598_v30 = vunpack.c.l.bf16 %v221_v23 }
 0x2d1   :  { %v3415_v50 = vadd.f32 %v3414_v46, %v3024_v40  ;;  %v2137_v40 = vrot.slane %v672_v16, %v3635_v2  ;;  %v3037_v46 = vmul.f32 %v2133_v35, %v587_v34  ;;  %v222_v34 = vld [vmem:[#allocation3 + $0x5b0] sm:$0xff]  ;;  %v2181_v35 = vrot.slane %v673_v56, %v3641_v8 }
 0x2d3   :  { %v3416_v55 = vadd.f32 %v3415_v50, %v3025_v45  ;;  %v2141_v45 = vrot.slane %v672_v16, %v3637_v3  ;;  %v3038_v50 = vmul.f32 %v2137_v40, %v588_v39  ;;  %v600_v39 = vunpack.c.l.bf16 %v222_v34 }
 0x2d4   :  { %v2185_v40 = vrot.slane %v673_v56, %v3646_v15 }
 0x2d5   :  { %v3417_v60 = vadd.f32 %v3416_v55, %v3026_v49  ;;  %v2145_v49 = vrot.slane %v672_v16, %v3639_v6 }
 0x2d7   :  { %v3418_v4 = vadd.f32 %v3417_v60, %v3027_v54  ;;  %v3039_v54 = vmul.f32 %v2141_v45, %v589_v44  ;;  %v601_v44 = vunpack.c.h.bf16 %v222_v34  ;;  %v2189_v45 = vrot.slane %v673_v56, %v3648_v17  ;;  %v228_v34 = vld [vmem:[#allocation3 + $0x5e0] sm:$0xff] }
 0x2d9   :  { %v3419_v10 = vadd.f32 %v3418_v4, %v3028_v59  ;;  %v3040_v59 = vmul.f32 %v2145_v49, %v590_v48  ;;  %v602_v48 = vunpack.c.l.bf16 %v223_v43  ;;  %v2193_v49 = vrot.slane %v673_v56, %v3652_v24 }
 0x2db   :  { %v3420_v14 = vadd.f32 %v3419_v10, %v3029_v1  ;;  %v3041_v1 = vmul.f32 %v2149_v53, %v591_v37  ;;  %v674_v37 = vld [vmem:[#allocation6 + $0x170] sm:$0xff]  ;;  %v603_v53 = vunpack.c.h.bf16 %v223_v43 }
 0x2dd   :  { %v3421_v21 = vadd.f32 %v3420_v14, %v3030_v9  ;;  %v3042_v9 = vmul.f32 %v2153_v58, %v592_v57  ;;  %v3043_v14 = vmul.f32 %v2157_v63, %v593_v62  ;;  %v604_v58 = vunpack.c.l.bf16 %v224_v52  ;;  %v225_v62 = vld [vmem:[#allocation3 + $0x5c8] sm:$0xff] }
 0x2de   :  { %v605_v63 = vunpack.c.h.bf16 %v224_v52 }
 0x2df   :  { %v3422_v28 = vadd.f32 %v3421_v21, %v3031_v13  ;;  %v2165_v13 = vrot.slane %v672_v16, %v3654_v27  ;;  %v3044_v21 = vmul.f32 %v2161_v7, %v594_v5  ;;  %v599_v16 = vunpack.c.h.bf16 %v221_v23  ;;  %v227_v23 = vld [vmem:[#allocation3 + $0x5d8] sm:$0xff] }
 0x2e0   :  { %v606_v7 = vunpack.c.l.bf16 %v225_v62 }
 0x2e1   :  { %v3423_v32 = vadd.f32 %v3422_v28, %v3032_v20  ;;  %v2169_v20 = vrot.slane %v673_v56, %v3635_v2  ;;  %v3045_v28 = vmul.f32 %v2165_v13, %v595_v12  ;;  %v226_v12 = vld [vmem:[#allocation3 + $0x5d0] sm:$0xff]  ;;  %v2213_v13 = vrot.slane %v674_v37, %v3641_v8 }
 0x2e3   :  { %v3424_v38 = vadd.f32 %v3423_v32, %v3033_v26  ;;  %v2173_v26 = vrot.slane %v673_v56, %v3637_v3  ;;  %v3046_v32 = vmul.f32 %v2169_v20, %v596_v19  ;;  %v608_v19 = vunpack.c.l.bf16 %v226_v12 }
 0x2e4   :  { %v2217_v20 = vrot.slane %v674_v37, %v3646_v15 }
 0x2e5   :  { %v3425_v42 = vadd.f32 %v3424_v38, %v3034_v31  ;;  %v2177_v31 = vrot.slane %v673_v56, %v3639_v6 }
 0x2e7   :  { %v3426_v47 = vadd.f32 %v3425_v42, %v3035_v36  ;;  %v3047_v36 = vmul.f32 %v2173_v26, %v597_v25  ;;  %v609_v25 = vunpack.c.h.bf16 %v226_v12  ;;  %v2221_v26 = vrot.slane %v674_v37, %v3648_v17  ;;  %v232_v12 = vld [vmem:[#allocation3 + $0x600] sm:$0xff] }
 0x2e9   :  { %v3427_v51 = vadd.f32 %v3426_v47, %v3036_v41  ;;  %v3048_v41 = vmul.f32 %v2177_v31, %v598_v30  ;;  %v610_v30 = vunpack.c.l.bf16 %v227_v23  ;;  %v2225_v31 = vrot.slane %v674_v37, %v3652_v24 }
 0x2eb   :  { %v3428_v55 = vadd.f32 %v3427_v51, %v3037_v46  ;;  %v3049_v46 = vmul.f32 %v2181_v35, %v599_v16  ;;  %v675_v16 = vld [vmem:[#allocation6 + $0x178] sm:$0xff]  ;;  %v611_v35 = vunpack.c.h.bf16 %v227_v23 }
 0x2ed   :  { %v3429_v60 = vadd.f32 %v3428_v55, %v3038_v50  ;;  %v3050_v50 = vmul.f32 %v2185_v40, %v600_v39  ;;  %v3051_v55 = vmul.f32 %v2189_v45, %v601_v44  ;;  %v612_v40 = vunpack.c.l.bf16 %v228_v34  ;;  %v229_v44 = vld [vmem:[#allocation3 + $0x5e8] sm:$0xff] }
 0x2ee   :  { %v613_v45 = vunpack.c.h.bf16 %v228_v34 }
 0x2ef   :  { %v3430_v4 = vadd.f32 %v3429_v60, %v3039_v54  ;;  %v2197_v54 = vrot.slane %v673_v56, %v3654_v27  ;;  %v3052_v60 = vmul.f32 %v2193_v49, %v602_v48  ;;  %v607_v56 = vunpack.c.h.bf16 %v225_v62  ;;  %v231_v62 = vld [vmem:[#allocation3 + $0x5f8] sm:$0xff] }
 0x2f0   :  { %v614_v49 = vunpack.c.l.bf16 %v229_v44 }
 0x2f1   :  { %v3431_v10 = vadd.f32 %v3430_v4, %v3040_v59  ;;  %v2201_v59 = vrot.slane %v674_v37, %v3635_v2  ;;  %v3053_v4 = vmul.f32 %v2197_v54, %v603_v53  ;;  %v230_v53 = vld [vmem:[#allocation3 + $0x5f0] sm:$0xff]  ;;  %v2245_v54 = vrot.slane %v675_v16, %v3641_v8 }
 0x2f3   :  { %v3432_v18 = vadd.f32 %v3431_v10, %v3041_v1  ;;  %v2205_v1 = vrot.slane %v674_v37, %v3637_v3  ;;  %v3054_v10 = vmul.f32 %v2201_v59, %v604_v58  ;;  %v616_v58 = vunpack.c.l.bf16 %v230_v53 }
 0x2f4   :  { %v2249_v59 = vrot.slane %v675_v16, %v3646_v15 }
 0x2f5   :  { %v3433_v22 = vadd.f32 %v3432_v18, %v3042_v9  ;;  %v2209_v9 = vrot.slane %v674_v37, %v3639_v6 }
 0x2f7   :  { %v3434_v29 = vadd.f32 %v3433_v22, %v3043_v14  ;;  %v3055_v14 = vmul.f32 %v2205_v1, %v605_v63  ;;  %v617_v63 = vunpack.c.h.bf16 %v230_v53  ;;  %v2253_v1 = vrot.slane %v675_v16, %v3648_v17 }
 0x2f9   :  { %v3435_v33 = vadd.f32 %v3434_v29, %v3044_v21  ;;  %v3056_v21 = vmul.f32 %v2209_v9, %v606_v7  ;;  %v618_v7 = vunpack.c.l.bf16 %v231_v62  ;;  %v2257_v9 = vrot.slane %v675_v16, %v3652_v24 }
 0x2fb   :  { %v3436_v38 = vadd.f32 %v3435_v33, %v3045_v28  ;;  %v3057_v28 = vmul.f32 %v2213_v13, %v607_v56  ;;  %v676_v56 = vld [vmem:[#allocation6 + $0x180] sm:$0xff]  ;;  %v619_v13 = vunpack.c.h.bf16 %v231_v62 }
 0x2fd   :  { %v3437_v42 = vadd.f32 %v3436_v38, %v3046_v32  ;;  %v3058_v32 = vmul.f32 %v2217_v20, %v608_v19  ;;  %v3059_v38 = vmul.f32 %v2221_v26, %v609_v25  ;;  %v620_v20 = vunpack.c.l.bf16 %v232_v12  ;;  %v233_v25 = vld [vmem:[#allocation3 + $0x608] sm:$0xff] }
 0x2fe   :  { %v621_v26 = vunpack.c.h.bf16 %v232_v12 }
 0x2ff   :  { %v3438_v47 = vadd.f32 %v3437_v42, %v3047_v36  ;;  %v2229_v36 = vrot.slane %v674_v37, %v3654_v27  ;;  %v3060_v42 = vmul.f32 %v2225_v31, %v610_v30  ;;  %v615_v37 = vunpack.c.h.bf16 %v229_v44 }
 0x300   :  { %v622_v31 = vunpack.c.l.bf16 %v233_v25  ;;  %v2285_v44 = vrot.slane %v676_v56, %v3648_v17  ;;  %v3472_v17 = vstv %s4061_s2  ;;  %s3559_s2 = scalar_lea.vmem %s3499_s10, 128 }
 0x301   :  { %v3439_v51 = vadd.f32 %v3438_v47, %v3048_v41  ;;  %v2233_v41 = vrot.slane %v675_v16, %v3635_v2  ;;  %v3061_v47 = vmul.f32 %v2229_v36, %v611_v35  ;;  %v234_v35 = vld [vmem:[#allocation3 + $0x610] sm:$0xff]  ;;  %v2277_v36 = vrot.slane %v676_v56, %v3641_v8  ;;  %p3560_p2 = scmp.ne.s32.totalorder %s3499_s10, %s3559_s2  ;;  %p3565_p4 = scmp.lt.s32.totalorder %s3559_s2, %s3559_s2 }
 0x302   :  { %v2293_v8 = vrot.slane %v676_v56, %v3654_v27 }
 0x303   :  { %v3440_v57 = vadd.f32 %v3439_v51, %v3049_v46  ;;  %v2237_v46 = vrot.slane %v675_v16, %v3637_v3  ;;  %v3062_v51 = vmul.f32 %v2233_v41, %v612_v40  ;;  %v2281_v40 = vrot.slane %v676_v56, %v3646_v15  ;;  %p3566_p5 = por %p3565_p4, %p3564_p3 }
 0x305   :  { %v3441_v61 = vadd.f32 %v3440_v57, %v3050_v50  ;;  %v2241_v50 = vrot.slane %v675_v16, %v3639_v6  ;;  %p3567_p6 = pnand %p3566_p5, %p3560_p2 }
 0x307   :  { %v3442_v5 = vadd.f32 %v3441_v61, %v3051_v55  ;;  %v3063_v55 = vmul.f32 %v2237_v46, %v613_v45 }
 0x309   :  { %v3443_v11 = vadd.f32 %v3442_v5, %v3052_v60  ;;  %v3064_v60 = vmul.f32 %v2241_v50, %v614_v49 }
 0x30b   :  { %v3444_v18 = vadd.f32 %v3443_v11, %v3053_v4  ;;  %v3065_v4 = vmul.f32 %v2245_v54, %v615_v37 }
 0x30d   :  { %v3445_v22 = vadd.f32 %v3444_v18, %v3054_v10  ;;  %v3066_v10 = vmul.f32 %v2249_v59, %v616_v58  ;;  %v3067_v18 = vmul.f32 %v2253_v1, %v617_v63  ;;  %v3486_v63 = vand.u32 127, %v726_v0 }
 0x30f   :  { %v3446_v29 = vadd.f32 %v3445_v22, %v3055_v14  ;;  %v2261_v14 = vrot.slane %v675_v16, %v3654_v27  ;;  %v3068_v22 = vmul.f32 %v2257_v9, %v618_v7  ;;  %v623_v16 = vunpack.c.h.bf16 %v233_v25 }
 0x310   :  { %vm3488_vm0 = vcmp.eq.s32.totalorder %v3486_v63, 1  ;;  %vm3487_vm2 = vcmp.eq.s32.totalorder %v3486_v63, 0 }
 0x311   :  { %v3447_v33 = vadd.f32 %v3446_v29, %v3056_v21  ;;  %v2265_v21 = vrot.slane %v676_v56, %v3635_v2  ;;  %v3069_v29 = vmul.f32 %v2261_v14, %v619_v13  ;;  %v624_v2 = vunpack.c.l.bf16 %v234_v35 }
 0x312   :  { %v3073_v45 = vmul.f32 %v2277_v36, %v623_v16 }
 0x313   :  { %v3448_v39 = vadd.f32 %v3447_v33, %v3057_v28  ;;  %v2269_v28 = vrot.slane %v676_v56, %v3637_v3  ;;  %v3070_v33 = vmul.f32 %v2265_v21, %v620_v20  ;;  %v625_v3 = vunpack.c.h.bf16 %v234_v35 }
 0x315   :  { %v3449_v43 = vadd.f32 %v3448_v39, %v3058_v32  ;;  %v2273_v32 = vrot.slane %v676_v56, %v3639_v6 }
 0x317   :  { %v3450_v48 = vadd.f32 %v3449_v43, %v3059_v38  ;;  %v3071_v38 = vmul.f32 %v2269_v28, %v621_v26  ;;  %v3072_v41 = vmul.f32 %v2273_v32, %v622_v31  ;;  %v235_v43 = vld [vmem:[#allocation3 + $0x618] sm:$0xff] }
 0x318   :  { %v626_v6 = vunpack.c.l.bf16 %v235_v43  ;;  %v627_v50 = vunpack.c.h.bf16 %v235_v43 }
 0x319   :  { %v3451_v52 = vadd.f32 %v3450_v48, %v3060_v42  ;;  %v3074_v48 = vmul.f32 %v2281_v40, %v624_v2 }
 0x31a   :  { %v3077_v37 = vmul.f32 %v2293_v8, %v627_v50 }
 0x31b   :  { %v3452_v57 = vadd.f32 %v3451_v52, %v3061_v47  ;;  %v2289_v47 = vrot.slane %v676_v56, %v3652_v24 }
 0x31d   :  { %v3453_v61 = vadd.f32 %v3452_v57, %v3062_v51  ;;  %v3075_v51 = vmul.f32 %v2285_v44, %v625_v3  ;;  %v3076_v53 = vmul.f32 %v2289_v47, %v626_v6 }
 0x31f   :  { %v3454_v5 = vadd.f32 %v3453_v61, %v3063_v55 }
 0x321   :  { %v3455_v11 = vadd.f32 %v3454_v5, %v3064_v60 }
 0x323   :  { %v3456_v19 = vadd.f32 %v3455_v11, %v3065_v4 }
 0x325   :  { %v3457_v23 = vadd.f32 %v3456_v19, %v3066_v10 }
 0x327   :  { %v3458_v30 = vadd.f32 %v3457_v23, %v3067_v18 }
 0x329   :  { %v3459_v34 = vadd.f32 %v3458_v30, %v3068_v22 }
 0x32b   :  { %v3460_v39 = vadd.f32 %v3459_v34, %v3069_v29 }
 0x32d   :  { %v3461_v42 = vadd.f32 %v3460_v39, %v3070_v33 }
 0x32f   :  { %v3462_v46 = vadd.f32 %v3461_v42, %v3071_v38 }
 0x331   :  { %v3463_v49 = vadd.f32 %v3462_v46, %v3072_v41 }
 0x333   :  { %v3464_v52 = vadd.f32 %v3463_v49, %v3073_v45 }
 0x335   :  { %v3465_v15 = vadd.f32 %v3464_v52, %v3074_v48 }
 0x337   :  { %v3466_v54 = vadd.f32 %v3465_v15, %v3075_v51 }
 0x339   :  { %v3467_v55 = vadd.f32 %v3466_v54, %v3076_v53 }
 0x33b   :  { %v3468_v57 = vadd.f32 %v3467_v55, %v3077_v37 }
 0x33d   :  { %3469 = vadd.xlane.f32.xlu0 %v3468_v57 }
 0x3ca   :  { %v3470_v58 = vpop.xlane.xlu0 %3469 }
 0x3cb   :  { %v3473_v24 = vadd.f32 %v3472_v17, %v3470_v58 }
 0x3cd   :  { %v3474_v59 = vand.u32 2147483647, %v3473_v24  ;;  %vm3482_vm1 = vcmp.ge.f32.partialorder %v3473_v24, 0.0 }
 0x3cf   :  { %v3475_v60 = vsub.f32 0.0, %v3474_v59 }
 0x3d1   :  { %v3476_v61 = vmul.f32 1.442695, %v3475_v60 }
 0x3d3   :  { %3511 = vpow2.f32 %v3476_v61 }
 0x3dd   :  { %v3512_v27 = vpop.eup %3511 }
 0x3de   :  { %v3478_v62 = vadd.f32 1.0, %v3512_v27 }
 0x3e0   :  { %3513 = vrcp.f32 %v3478_v62 }
 0x3ea   :  { %v3514_v1 = vpop.eup %3513 }
 0x3eb   :  { %v3481_v4 = vmul.f32 %v3514_v1, %v3512_v27 }
 0x3ed   :  { %v3483_v5 = vsel %vm3482_vm1, %v3514_v1, %v3481_v4  ;;  %v3484_v7 = vsel %vm3482_vm1, %v3481_v4, %v3514_v1 }
 0x3ee   :  { %v3489_v9 = vsel %vm3488_vm0, %v3483_v5, 0.0 }
 0x3ef   :  { %v3490_v10 = vsel %vm3487_vm2, %v3484_v7, %v3489_v9 }
 0x3f0   :  { %3491 = vst [vmem:[#allocation8] sm:$0xff] %v3490_v10 }
 0x3f1   :  { %3570 = shalt.err (!%p3567_p6)
}
 0x3f2   :  { %s3571_s13 = scalar_lea.hbm %s4062_s3, 128 }
 0x3f3   :  { %p3572_p7 = scmp.ne.s32.totalorder %s4062_s3, %s3571_s13  ;;  %p3575_p8 = scmp.lt.u32.totalorder %s3571_s13, %s4062_s3 }
 0x3f5   :  { %p3577_p9 = pnand %p3575_p8, %p3572_p7 }
 0x3f7   :  { %3580 = shalt.err (!%p3577_p9)
}
 0x3f8   :  { %3501 = dma.vmem_to_hbm [thread:$0]  %s3499_s10, 128, %s4062_s3, [#allocation5]  }
 0x3f9   :  { %3585 = dma.done.wait [#allocation5], 128  }
 0x3fa   :  { %3586 = vsyncadd [#allocation5], 4294967168 }
 0x3fb   :  { %3505 = vsyncpa [#allocation4], 1 }
 0x3fc   :  { %3506 = vsyncpa [#allocation7], 1 }
 0x3fd   :  { %3507 = vsyncpa [#allocation5], 1 }

</bundles_post_ra>
